<compile_context>
chip_gen: v7x
topology: tpu7x:2x2x1
jax: 0.10.0
libtpu: 0.0.40
codegen_flags: <defaults>
</compile_context>

<pallas_src>
import functools

import jax
import jax.numpy as jnp
from jax import lax
from jax.experimental import pallas as pl
from jax.experimental.pallas import tpu as pltpu


def _round_up(v, m):
    return (v + m - 1) // m * m


def _attn_gated_kernel(x_ref, wvu_ref, bvu_ref, ww_ref, *rest,
                       dp, n_valid, tile, is_norm):
    """Grid = (bags, n_tiles).  x_ref: (tile, L); a_ref: (K, n_pad) resident."""
    if is_norm:
        (a_ref,) = rest
        bw_ref = None
    else:
        bw_ref, a_ref = rest

    n = pl.program_id(1)

    # Fused gated projection: one (tile, L) x (L, 2*Dp) matmul, bf16 in, f32 acc.
    h = jnp.dot(x_ref[...], wvu_ref[...],
                preferred_element_type=jnp.float32) + bvu_ref[...]
    a_v = jnp.tanh(h[:, :dp])                       # (tile, Dp), f32
    a_u = jax.nn.sigmoid(h[:, dp:])                 # (tile, Dp), f32
    gated = a_v * a_u                               # padded gate columns are 0

    # Scores directly lane-dense (K, tile): contract Dp (last axes), q@k^T-style.
    s = lax.dot_general(ww_ref[...], gated, (((1,), (1,)), ((), ())),
                        preferred_element_type=jnp.float32)
    if not is_norm:
        s = s + bw_ref[...]                         # bw only matters without softmax

    off = pl.multiple_of(n * tile, tile)
    a_ref[:, pl.ds(off, tile)] = s                  # raw scores into resident block

    if is_norm:
        # On the last instance tile: masked softmax over N (lanes), in place.
        @pl.when(n == pl.num_programs(1) - 1)
        def _():
            s_all = a_ref[...]                      # (K, n_pad)
            n_pad = s_all.shape[-1]
            if n_valid < n_pad:                     # mask zero-padded instances
                col = lax.broadcasted_iota(jnp.int32, s_all.shape, 1)
                s_all = jnp.where(col < n_valid, s_all, -jnp.inf)
            m = jnp.max(s_all, axis=-1, keepdims=True)
            e = jnp.exp(s_all - m)
            a_ref[...] = e / jnp.sum(e, axis=-1, keepdims=True)   # exact normalize


def attention_gated_forward(x, params, *, is_norm=True, tile_n=1024,
                            compute_dtype=jnp.bfloat16):
    """x: (B, N, L) or (N, L).  params in PyTorch layout:
       wv, wu: (D, L); bv, bu: (D,); ww: (K, D); bw: (K,).
    Returns A of shape (B, K, N) (or (K, N) for 2-D input)."""
    squeeze = (x.ndim == 2)
    if squeeze:
        x = x[None]
    B, N, L = x.shape
    D = params["wv"].shape[0]
    K = params["ww"].shape[0]
    Dp = _round_up(D, 128)   # lane-align each gate half so h slices never split a vreg

    # Pack weights as (in, out) so the kernel computes x @ W + b (== PyTorch's
    # x @ W.T + b).  Fuse V and U along the output dim; zero-pad each half (and
    # Ww's contraction dim) to Dp lanes — padded columns contribute exactly 0.
    def pad_d(w):  # (D, L) -> (Dp, L)
        return jnp.pad(w, ((0, Dp - D), (0, 0))) if Dp != D else w

    w_vu = jnp.concatenate([pad_d(params["wv"]).T, pad_d(params["wu"]).T],
                           axis=1).astype(compute_dtype)                    # (L, 2Dp)
    b_vu = jnp.concatenate([jnp.pad(params["bv"], (0, Dp - D)),
                            jnp.pad(params["bu"], (0, Dp - D))]
                           ).reshape(1, 2 * Dp).astype(jnp.float32)
    ww = jnp.pad(params["ww"], ((0, 0), (0, Dp - D))).astype(jnp.float32)   # (K, Dp)
    bw = params["bw"].reshape(K, 1).astype(jnp.float32)

    # Instance tile: multiple of 128 (default 1024 = multiple of 256 for the
    # 256-wide MXUs), capped so the double-buffered x tile stays within ~8 MiB
    # of VMEM (safe under v5e's 16 MiB scoped default and v7x's 64 MiB VMEM).
    itemsize = jnp.dtype(compute_dtype).itemsize
    vmem_cap_rows = max(128, (8 * 1024 * 1024) // (2 * L * itemsize))
    tile = min(max(tile_n, 128), _round_up(N, 128), vmem_cap_rows)
    tile = max(128, (tile // 128) * 128)
    n_pad = _round_up(N, tile)
    nt = n_pad // tile

    xp = x.astype(compute_dtype)
    if n_pad != N:
        xp = jnp.pad(xp, ((0, 0), (0, n_pad - N), (0, 0)))

    kernel = functools.partial(_attn_gated_kernel, dp=Dp, n_valid=N, tile=tile,
                               is_norm=is_norm)

    inputs = [xp, w_vu, b_vu, ww]
    in_specs = [
        pl.BlockSpec((None, tile, L), lambda b, n: (b, n, 0)),      # x tile (bf16)
        pl.BlockSpec((L, 2 * Dp), lambda b, n: (0, 0)),             # fused W (bf16)
        pl.BlockSpec((1, 2 * Dp), lambda b, n: (0, 0)),             # fused bias
        pl.BlockSpec((K, Dp), lambda b, n: (0, 0)),                 # Ww
    ]
    if not is_norm:
        inputs.append(bw)
        in_specs.append(pl.BlockSpec((K, 1), lambda b, n: (0, 0)))  # bw

    a = pl.pallas_call(
        kernel,
        out_shape=jax.ShapeDtypeStruct((B, K, n_pad), jnp.float32),
        grid_spec=pltpu.PrefetchScalarGridSpec(
            num_scalar_prefetch=0,
            grid=(B, nt),
            in_specs=in_specs,
            out_specs=pl.BlockSpec((None, K, n_pad), lambda b, n: (b, 0, 0)),
        ),
        compiler_params=pltpu.CompilerParams(
            dimension_semantics=("parallel", "arbitrary")),
    )(*inputs)

    a = a[:, :, :N]
    return a[0] if squeeze else a


def init_params(key, L, D, K):
    """PyTorch nn.Linear-style init (uniform +- 1/sqrt(fan_in)), PyTorch layout."""
    ks = jax.random.split(key, 6)

    def lin(kw, kb, fan_in, fan_out):
        bound = 1.0 / jnp.sqrt(fan_in)
        w = jax.random.uniform(kw, (fan_out, fan_in), jnp.float32, -bound, bound)
        b = jax.random.uniform(kb, (fan_out,), jnp.float32, -bound, bound)
        return w, b

    wv, bv = lin(ks[0], ks[1], L, D)   # attention_V
    wu, bu = lin(ks[2], ks[3], L, D)   # attention_U
    ww, bw = lin(ks[4], ks[5], D, K)   # attention_weights
    return dict(wv=wv, bv=bv, wu=wu, bu=bu, ww=ww, bw=bw)


def attention_gated_reference(x, p, is_norm=True, compute_dtype=jnp.float32):
    """Pure-JAX replica of the PyTorch forward, with the kernel's mixed
    precision (compute_dtype matmul inputs, f32 accumulation/epilogue)."""
    if x.ndim == 2:
        x = x[None]
    xc = x.astype(compute_dtype)
    wv = p["wv"].astype(compute_dtype)
    wu = p["wu"].astype(compute_dtype)

    def one(xb):
        a_v = jnp.tanh(jnp.dot(xb, wv.T, preferred_element_type=jnp.float32)
                       + p["bv"])
        a_u = jax.nn.sigmoid(jnp.dot(xb, wu.T, preferred_element_type=jnp.float32)
                             + p["bu"])
        s = jnp.dot(a_v * a_u, p["ww"].T,
                    preferred_element_type=jnp.float32) + p["bw"]       # (N, K)
        s = s.T                                                         # (K, N)
        return jax.nn.softmax(s, axis=1) if is_norm else s

    return jax.vmap(one)(xc)


if __name__ == "__main__":
    # Module defaults L=512, D=128, K=1; 2 bags of 256 instances.
    B, N, L, D, K = 2, 256, 512, 128, 1

    key = jax.random.PRNGKey(0)
    kx, kx2, kp = jax.random.split(key, 3)
    x = jax.random.normal(kx, (B, N, L), jnp.float32)
    params = init_params(kp, L, D, K)

    # normalized path (isNorm=True)
    a = attention_gated_forward(x, params, is_norm=True)
    jax.block_until_ready(a)
    a_ref = attention_gated_reference(x, params, is_norm=True,
                                      compute_dtype=jnp.bfloat16)
    assert a.shape == (B, K, N)
    assert jnp.allclose(a, a_ref, atol=2e-3, rtol=2e-3), \
        float(jnp.max(jnp.abs(a - a_ref)))
    # exact normalization: per-bag softmax rows sum to 1
    assert jnp.allclose(jnp.sum(a, axis=-1), 1.0, atol=1e-4)

    # ragged bag: N not a tile multiple -> zero-pad + masked softmax, 2 tiles
    N2 = 200
    x2 = jax.random.normal(kx2, (B, N2, L), jnp.float32)
    a2 = attention_gated_forward(x2, params, is_norm=True, tile_n=128)
    a2_ref = attention_gated_reference(x2, params, is_norm=True,
                                       compute_dtype=jnp.bfloat16)
    assert a2.shape == (B, K, N2)
    assert jnp.allclose(a2, a2_ref, atol=2e-3, rtol=2e-3), \
        float(jnp.max(jnp.abs(a2 - a2_ref)))
    assert jnp.allclose(jnp.sum(a2, axis=-1), 1.0, atol=1e-4)

    # unnormalized path (isNorm=False) keeps the bw add
    a_raw = attention_gated_forward(x, params, is_norm=False)
    a_raw_ref = attention_gated_reference(x, params, is_norm=False,
                                          compute_dtype=jnp.bfloat16)
    assert a_raw.shape == (B, K, N)
    assert jnp.allclose(a_raw, a_raw_ref, atol=2e-3, rtol=2e-3), \
        float(jnp.max(jnp.abs(a_raw - a_raw_ref)))

    print("KERNEL_OK")
</pallas_src>

<mosaic_0001>
module attributes {stable_mosaic.version = 11 : i64} {
  func.func @_attn_gated_kernel(%arg0: i32, %arg1: i32, %arg2: memref<1x256x512xbf16, #tpu.memory_space<vmem>>, %arg3: memref<512x256xbf16, #tpu.memory_space<vmem>>, %arg4: memref<1x256xf32, #tpu.memory_space<vmem>>, %arg5: memref<1x128xf32, #tpu.memory_space<vmem>>, %arg6: memref<1x1x256xf32, #tpu.memory_space<vmem>>) attributes {dimension_semantics = [#tpu.dimension_semantics<parallel>, #tpu.dimension_semantics<arbitrary>], iteration_bounds = array<i64: 2, 1>, scalar_prefetch = 0 : i64, scratch_operands = 0 : i64, tpu.core_type = #tpu.core_type<tc>, window_params = [{transform_indices = @transform_0, window_bounds = array<i64: 1, 256, 512>}, {pipeline_mode = #tpu.pipeline_mode<synchronous>, transform_indices = @transform_1, window_bounds = array<i64: 512, 256>}, {pipeline_mode = #tpu.pipeline_mode<synchronous>, transform_indices = @transform_2, window_bounds = array<i64: 1, 256>}, {pipeline_mode = #tpu.pipeline_mode<synchronous>, transform_indices = @transform_3, window_bounds = array<i64: 1, 128>}, {transform_indices = @transform_4, window_bounds = array<i64: 1, 1, 256>}]} {
    %c0 = arith.constant 0 : index
    %c0_0 = arith.constant 0 : index
    %c0_1 = arith.constant 0 : index
    %0 = vector.load %arg2[%c0, %c0_0, %c0_1] : memref<1x256x512xbf16, #tpu.memory_space<vmem>>, vector<1x256x512xbf16>
    %1 = vector.shape_cast %0 : vector<1x256x512xbf16> to vector<256x512xbf16>
    %c0_2 = arith.constant 0 : index
    %c0_3 = arith.constant 0 : index
    %2 = vector.load %arg3[%c0_2, %c0_3] : memref<512x256xbf16, #tpu.memory_space<vmem>>, vector<512x256xbf16>
    %cst = arith.constant dense<0.000000e+00> : vector<256x256xf32>
    %3 = tpu.matmul %1, %2, %cst {dimension_numbers = #tpu.dot_dimension_numbers<[1], [0], [0], [1], [0, 0, 1, 1], [], []>} : vector<256x512xbf16>, vector<512x256xbf16>, vector<256x256xf32> -> vector<256x256xf32>
    %c0_4 = arith.constant 0 : index
    %c0_5 = arith.constant 0 : index
    %4 = vector.load %arg4[%c0_4, %c0_5] : memref<1x256xf32, #tpu.memory_space<vmem>>, vector<1x256xf32>
    %5 = vector.broadcast %4 : vector<1x256xf32> to vector<256x256xf32>
    %6 = arith.addf %3, %5 : vector<256x256xf32>
    %7 = vector.extract_strided_slice %6 {offsets = [0, 0], sizes = [256, 128], strides = [1, 1]} : vector<256x256xf32> to vector<256x128xf32>
    %8 = math.tanh %7 : vector<256x128xf32>
    %9 = vector.extract_strided_slice %6 {offsets = [0, 128], sizes = [256, 128], strides = [1, 1]} : vector<256x256xf32> to vector<256x128xf32>
    %10 = arith.negf %9 : vector<256x128xf32>
    %11 = math.exp %10 : vector<256x128xf32>
    %cst_6 = arith.constant 1.000000e+00 : f32
    %12 = vector.broadcast %cst_6 : f32 to vector<256x128xf32>
    %13 = arith.addf %12, %11 : vector<256x128xf32>
    %14 = arith.divf %12, %13 : vector<256x128xf32>
    %15 = arith.mulf %8, %14 : vector<256x128xf32>
    %c0_7 = arith.constant 0 : index
    %c0_8 = arith.constant 0 : index
    %16 = vector.load %arg5[%c0_7, %c0_8] : memref<1x128xf32, #tpu.memory_space<vmem>>, vector<1x128xf32>
    %cst_9 = arith.constant dense<0.000000e+00> : vector<1x256xf32>
    %17 = tpu.matmul %16, %15, %cst_9 {dimension_numbers = #tpu.dot_dimension_numbers<[1], [1], [0], [0], [0, 0, 1, 0], [], []>} : vector<1x128xf32>, vector<256x128xf32>, vector<1x256xf32> -> vector<1x256xf32>
    %c256_i32 = arith.constant 256 : i32
    %18 = arith.muli %arg1, %c256_i32 : i32
    %19 = tpu.assume_multiple %18, 256 : i32
    %c0_10 = arith.constant 0 : index
    %c0_11 = arith.constant 0 : index
    %20 = arith.index_cast %19 : i32 to index
    %21 = vector.load %arg6[%c0_10, %c0_11, %20] : memref<1x1x256xf32, #tpu.memory_space<vmem>>, vector<1x1x256xf32>
    %22 = vector.shape_cast %21 : vector<1x1x256xf32> to vector<1x256xf32>
    %23 = vector.shape_cast %17 : vector<1x256xf32> to vector<1x1x256xf32>
    tpu.vector_store %arg6[%c0_10, %c0_11, %20], %23 {strides = array<i32>} : memref<1x1x256xf32, #tpu.memory_space<vmem>>, vector<1x1x256xf32>,
    %c0_i32 = arith.constant 0 : i32
    %24 = arith.cmpi eq, %arg1, %c0_i32 : i32
    %25 = arith.extui %24 : i1 to i32
    %c0_i32_12 = arith.constant 0 : i32
    %26 = arith.cmpi ne, %25, %c0_i32_12 : i32
    scf.if %26 {
      %c0_13 = arith.constant 0 : index
      %c0_14 = arith.constant 0 : index
      %c0_15 = arith.constant 0 : index
      %27 = vector.load %arg6[%c0_13, %c0_14, %c0_15] : memref<1x1x256xf32, #tpu.memory_space<vmem>>, vector<1x1x256xf32>
      %28 = vector.shape_cast %27 : vector<1x1x256xf32> to vector<1x256xf32>
      %cst_16 = arith.constant dense<0xFF800000> : vector<1xf32>
      %29 = vector.multi_reduction <maximumf>, %28, %cst_16 [1] : vector<1x256xf32> to vector<1xf32>
      %30 = vector.shape_cast %29 : vector<1xf32> to vector<1x1xf32>
      %31 = vector.broadcast %30 : vector<1x1xf32> to vector<1x256xf32>
      %32 = arith.subf %28, %31 : vector<1x256xf32>
      %33 = math.exp %32 : vector<1x256xf32>
      %cst_17 = arith.constant dense<0.000000e+00> : vector<1xf32>
      %34 = vector.multi_reduction <add>, %33, %cst_17 [1] : vector<1x256xf32> to vector<1xf32>
      %35 = vector.shape_cast %34 : vector<1xf32> to vector<1x1xf32>
      %36 = vector.broadcast %35 : vector<1x1xf32> to vector<1x256xf32>
      %37 = arith.divf %33, %36 : vector<1x256xf32>
      %c0_18 = arith.constant 0 : index
      %c0_19 = arith.constant 0 : index
      %c0_20 = arith.constant 0 : index
      %38 = vector.load %arg6[%c0_18, %c0_19, %c0_20] : memref<1x1x256xf32, #tpu.memory_space<vmem>>, vector<1x1x256xf32>
      %39 = vector.shape_cast %38 : vector<1x1x256xf32> to vector<1x256xf32>
      %40 = vector.shape_cast %37 : vector<1x256xf32> to vector<1x1x256xf32>
      tpu.vector_store %arg6[%c0_18, %c0_19, %c0_20], %40 {strides = array<i32>} : memref<1x1x256xf32, #tpu.memory_space<vmem>>, vector<1x1x256xf32>,
    } else {
    }
    return
  }
  func.func @transform_0(%arg0: i32, %arg1: i32) -> (i32, i32, i32) {
    %c0_i32 = arith.constant 0 : i32
    %c0_i32_0 = arith.constant 0 : i32
    return %arg0, %arg1, %c0_i32 : i32, i32, i32
  }
  func.func @transform_1(%arg0: i32, %arg1: i32) -> (i32, i32) {
    %c0_i32 = arith.constant 0 : i32
    %c0_i32_0 = arith.constant 0 : i32
    %c0_i32_1 = arith.constant 0 : i32
    return %c0_i32, %c0_i32_0 : i32, i32
  }
  func.func @transform_2(%arg0: i32, %arg1: i32) -> (i32, i32) {
    %c0_i32 = arith.constant 0 : i32
    %c0_i32_0 = arith.constant 0 : i32
    %c0_i32_1 = arith.constant 0 : i32
    return %c0_i32, %c0_i32_0 : i32, i32
  }
  func.func @transform_3(%arg0: i32, %arg1: i32) -> (i32, i32) {
    %c0_i32 = arith.constant 0 : i32
    %c0_i32_0 = arith.constant 0 : i32
    %c0_i32_1 = arith.constant 0 : i32
    return %c0_i32, %c0_i32_0 : i32, i32
  }
  func.func @transform_4(%arg0: i32, %arg1: i32) -> (i32, i32, i32) {
    %c0_i32 = arith.constant 0 : i32
    %c0_i32_0 = arith.constant 0 : i32
    %c0_i32_1 = arith.constant 0 : i32
    return %arg0, %c0_i32, %c0_i32_0 : i32, i32, i32
  }
}

</mosaic_0001>

<bundles_post_ra>
// kernel: tpu_custom_call.1
= control target key start
LH: loop header
LB: loop body
LE: loop exit
PB: predicated region body
PF: predicated region fallthrough
CT: control target
= control target key end

     0   :  { %9 = vsyncpa [#allocation3], 0  ;;  %s3497_s0 = inlined_call_operand.hbm [shape: bf16[2,256,512], index: 0, kind: input, shape index: {}]   ;;  %s3498_s1 = inlined_call_operand.hbm [shape: bf16[512,256], index: 1, kind: input, shape index: {}]   ;;  %s3499_s2 = inlined_call_operand.vmem [shape: f32[1,256], index: 2, kind: input, shape index: {}]   ;;  %s3500_s3 = inlined_call_operand.vmem [shape: f32[1,128], index: 3, kind: input, shape index: {}]   ;;  %s3501_s4 = inlined_call_operand.hbm [shape: f32[2,1,256], index: 4, kind: output, shape index: {}]  }
   0x1   :  { %11 = vsyncpa [#allocation3 + $0x1], 0 }
   0x2   :  { %12 = vsyncpa [#allocation6], 0 }
   0x3   :  { %13 = vsyncpa [#allocation4], 0 }
   0x4   :  { %15 = vsyncpa [#allocation4 + $0x1], 0  ;;  %s2951_s15 = smov 0   ;;  %s2953_s16 = smov 0  }
   0x5   :  { %s2955_s17 = smov 0   ;;  %s2957_s18 = smov 0  }
   0x6   :  { %s2959_s19 = smov 0   ;;  %s2961_s20 = smov 0  }
   0x7 LB: > { %s1933_s21 = sadd.s32 4294967295, %s2916_s20   ;;  %s1934_s22 = sadd.s32 4294967294, %s2916_s20   ;;  %s2916_s20 = sphi %s2961_s20, %s21_s20   ;;  %s2912_s19 = sphi %s2959_s19, %s3527_s19   ;;  %s2908_s18 = sphi %s2957_s18, %s3526_s18   ;;  %s2904_s17 = sphi %s2955_s17, %s3525_s17   ;;  %s2900_s16 = sphi %s2953_s16, %s3524_s16   ;;  %s2896_s15 = sphi %s2951_s15, %s3523_s15  }
   0x8   : > { %p55_p0 = scmp.ne.s32.totalorder %s2900_s16, %s2896_s15  ;;  %p2985_p1 = scmp.eq.s32.totalorder %s1933_s21, 0 }
   0x9   : > { %p2989_p2 = scmp.eq.s32.totalorder %s1933_s21, 1  ;;  %p148_p3 = scmp.eq.s32.totalorder %s1934_s22, 1 }
   0xa   : > { %s3506_s23 = scalar_select %p2985_p1, 1, 0 }
   0xb   : > { %s3507_s24 = scalar_select %p2989_p2, 1, 0 }
   0xc   : > { %p2995_p4 = por %p2985_p1, %p55_p0  ;;  %p1935_p5 = scmp.ge.s32.totalorder %s2916_s20, 1 }
   0xd   : > { %p3000_p6 = por %p148_p3, %p55_p0  ;;  %p155_p7 = scmp.lt.s32.totalorder %s2916_s20, 3 }
   0xe   : > { %s3508_s25 = scalar_select %p2995_p4, 1, 0 }
   0xf   : > { %s3509_s26 = scalar_select %p3000_p6, 1, 0 }
  0x10   : > { %p3005_p8 = pnand %p1935_p5, %p155_p7  ;;  %s2918_s28 = smov [#allocation5]  }
  0x11   : > { %s167_s29 = sshll.u32 %s2918_s28, 4  ;;  %s33_s5 = sadd.s32 1, %s2912_s19  ;;  %s168_s29 = int_to_ptr.vmem [resolvable:$true] %s167_s29 }
  0x12   : > { %s3510_s27 = scalar_select %p3005_p8, 1, 0 }
  0x13   : > { %p2314_p9 = pneg %p3005_p8  ;;  %s2772_s8 = scalar_lea.hbm %s3498_s1, 8192 }
  0x14   : > { %p2773_p12 = scmp.ne.s32.totalorder %s3498_s1, %s2772_s8  ;;  %p2779_p5 = scmp.lt.u32.totalorder %s2772_s8, %s3498_s1 }
  0x15   : > { %p3014_p11 = pnand %p2314_p9, %p2985_p1 }
  0x17   : > { %p2774_p13 = pneg %p3014_p11 }
  0x19   : > { %p2775_p0 = pnand %p2774_p13, %p2773_p12 }
  0x1b   : > { %p2776_p3 = pneg %p2775_p0 }
  0x1d   : > { %p2781_p7 = pnand %p2779_p5, %p2776_p3 }
  0x1f   : > { %2784 = shalt.err (!%p2781_p7)
}
  0x20   : > { %s2785_s13 = scalar_lea.vmem %s168_s29, 8192  ;;  %p2793_p1 = scmp.lt.s32.totalorder %s168_s29, %s168_s29 }
  0x21   : > { %p2786_p9 = scmp.ne.s32.totalorder %s168_s29, %s2785_s13  ;;  %p2794_p4 = scmp.lt.s32.totalorder %s2785_s13, %s2785_s13 }
  0x23   : > { %p2788_p10 = pnand %p2786_p9, %p2774_p13  ;;  %p2795_p8 = por %p2794_p4, %p2793_p1 }
  0x25   : > { %p2789_p6 = pneg %p2788_p10 }
  0x27   : > { %p2796_p2 = pnand %p2795_p8, %p2789_p6 }
  0x29   : > { %2799 = shalt.err (!%p2796_p2)
}
  0x2a   : > { %s2919_s14 = smov 128   ;;  %s2920_s21 = smov 8  }
  0x2b   : > { %2317 = dma.hbm_to_vmem [thread:$0]  (!%p3014_p11), %s3498_s1, 8192, %s168_s29, [#allocation6], %s2919_s14, %s2919_s14, %s2920_s21  }
  0x2c   : > { %p35_p1 = scmp.ge.s32.totalorder %s33_s5, 2  ;;  %s42_s6 = sadd.s32 1, %s2904_s17 }
  0x2d   : > { %p49_p2 = scmp.ne.s32.totalorder %s2904_s17, %s2900_s16  ;;  %p50_p4 = scmp.eq.s32.totalorder %s2916_s20, 0 }
  0x2e   : > { %s3529_s5 = smov (%p35_p1, %s33_s5), 0  ;;  %p3513_p8 = scmp.ne.s32.totalorder %s3507_s24, 0 }
  0x2f   : > { %p3041_p6 = por %p50_p4, %p49_p2  ;;  %s37_s30 = ssub.s32 %s2912_s19, %s3529_s5 }
  0x30   : > { %p3047_p10 = por %p3513_p8, %p49_p2  ;;  %p2327_p12 = scmp.lt.s32.totalorder %s2916_s20, 2 }
  0x31   : > { %p40_p11 = scmp.eq.s32.totalorder %s37_s30, 0  ;;  %s187_s29 = sand.u32 1, %s2904_s17  }
  0x32   : > { %s1938_s9 = sshll.u32 %s187_s29, 9  ;;  %s2110_s11 = sshll.u32 %s2912_s19, 13 }
  0x33   : > { %s3056_s10 = scalar_select %p40_p11, %s2904_s17, %s42_s6  }
  0x34   : > { %s3062_s14 = scalar_lea.hbm %s3497_s0, %s2110_s11  ;;  %s191_s24 = scalar_lea.vmem [#allocation2], %s1938_s9 }
  0x35   : > { %s201_s21 = sshll.u32 %s191_s24, 4  ;;  %p3068_p13 = pnand %p2327_p12, %p3041_p6  ;;  %s3064_s21 = int_to_ptr.vmem [resolvable:$true] %s201_s21 }
  0x36   : > { %s3072_s28 = scalar_lea.sflag [#allocation3], %s187_s29  ;;  %s2800_s6 = scalar_lea.hbm %s3062_s14, 8192 }
  0x37   : > { %p2801_p0 = scmp.ne.s32.totalorder %s3062_s14, %s2800_s6  ;;  %p2802_p3 = pneg %p3068_p13 }
  0x38   : > { %s2805_s7 = scalar_lea.hbm %s3497_s0, 16384  ;;  %p2806_p9 = scmp.lt.u32.totalorder %s3062_s14, %s3497_s0 }
  0x39   : > { %p2803_p5 = pnand %p2802_p3, %p2801_p0  ;;  %p2807_p1 = scmp.lt.u32.totalorder %s2805_s7, %s2800_s6 }
  0x3a   : > { %p2809_p4 = scmp.lt.u32.totalorder %s2800_s6, %s3062_s14 }
  0x3b   : > { %p2804_p7 = pneg %p2803_p5  ;;  %p2808_p2 = por %p2807_p1, %p2806_p9 }
  0x3d   : > { %p2810_p6 = por %p2809_p4, %p2808_p2 }
  0x3f   : > { %p2811_p8 = pnand %p2810_p6, %p2804_p7 }
  0x41   : > { %2814 = shalt.err (!%p2811_p8)
}
  0x42   : > { %s2815_s29 = scalar_lea.vmem %s3064_s21, 8192  ;;  %s2921_s13 = smov [#allocation2]  }
  0x43   : > { %p2816_p12 = scmp.ne.s32.totalorder %s3064_s21, %s2815_s29  ;;  %s2820_s24 = sshll.u32 %s2921_s13, 4  ;;  %s2821_s24 = int_to_ptr.vmem [resolvable:$false] %s2820_s24 }
  0x44   : > { %s2822_s30 = scalar_lea.vmem %s2821_s24, 16384  ;;  %p2823_p5 = scmp.lt.s32.totalorder %s3064_s21, %s2821_s24 }
  0x45   : > { %p2818_p11 = pnand %p2816_p12, %p2802_p3  ;;  %p2824_p9 = scmp.lt.s32.totalorder %s2822_s30, %s2815_s29 }
  0x47   : > { %p2819_p0 = pneg %p2818_p11  ;;  %p2825_p1 = por %p2824_p9, %p2823_p5 }
  0x49   : > { %p2826_p2 = pnand %p2825_p1, %p2819_p0 }
  0x4b   : > { %2829 = shalt.err (!%p2826_p2)
}
  0x4c   : > { %s2922_s6 = smov 256   ;;  %s2923_s9 = smov 16  }
  0x4d   : > { %2321 = dma.hbm_to_vmem [thread:$0]  (!%p3068_p13), %s3062_s14, 8192, %s3064_s21, %s3072_s28, %s2922_s6, %s2922_s6, %s2923_s9  }
  0x4e   : > { %p3516_p3 = scmp.ne.s32.totalorder %s3510_s27, 0 }
  0x4f   : > { %s3103_s7 = sand.u32 (!%p3516_p3), 1, %s2900_s16   ;;  %p3517_p7 = scmp.ne.s32.totalorder (!%p3516_p3), %s3508_s25, 0 }
  0x50   : > { %213 = sbr.rel (%p3516_p3) target bundleno = 1102 (0x44e), region = 36  ;;  %s1942_s11 = sshll.u32 (!%p3516_p3), %s3103_s7, 9 }
  0x51   : > { %s216_s12 = scalar_lea.sflag (!%p3516_p3), [#allocation3], %s3103_s7  ;;  %s3107_s29 = scalar_lea.vmem (!%p3516_p3), [#allocation2], %s1942_s11 }
  0x57   : > { %2883 = dma.done.wait (%p3517_p7), %s216_s12, 8192  }
  0x58   : > { %2885 = vsyncadd (%p3517_p7), %s216_s12, 4294959104  ;;  %p3518_p13 = scmp.ne.s32.totalorder %s3506_s23, 0 }
  0x5a   : > { %2887 = dma.done.wait (%p3518_p13), [#allocation6], 8192  }
  0x5b   : > { %2889 = vsyncadd (%p3518_p13), [#allocation6], 4294959104  ;;  %v2384_v0 = vld [vmem:[#allocation5 + $0x4] ss:$8 sps:$4 sm:$0xff]   ;;  %v2388_v2 = vld [vmem:[#allocation5] ss:$8 sps:$4 sm:$0xff]  }
  0x5c   : > { %v2386_v1 = vld [vmem:[#allocation5 + $0x104] ss:$8 sps:$4 sm:$0xff]   ;;  %1029 = vmatprep.subr.bf16.mxu1 %v2384_v0  ;;  %v2389_v3 = vld [vmem:[#allocation5 + $0x100] ss:$8 sps:$4 sm:$0xff]   ;;  %v2390_v4 = vld [vmem:[#allocation5 + $0x14] ss:$8 sps:$4 sm:$0xff]  }
  0x5d   : > { %1222 = vmatprep.subr.bf16.mxu0 %v2386_v1  ;;  %1030 = vmatpush1.bf16.msra.mxu1 %v2388_v2  ;;  %v2392_v5 = vld [vmem:[#allocation5 + $0x114] ss:$8 sps:$4 sm:$0xff]   ;;  %v2394_v6 = vld [vmem:[#allocation5 + $0x10] ss:$8 sps:$4 sm:$0xff]   ;;  %v2396_v8 = vld [vmem:[#allocation5 + $0x24] ss:$8 sps:$4 sm:$0xff]  }
  0x5e   : > { %1223 = vmatpush1.bf16.msra.mxu0 %v2389_v3  ;;  %1031 = vmatprep.subr.bf16.mxu1 %v2390_v4  ;;  %v2395_v7 = vld [vmem:[#allocation5 + $0x110] ss:$8 sps:$4 sm:$0xff]   ;;  %v2398_v9 = vld [vmem:[#allocation5 + $0x124] ss:$8 sps:$4 sm:$0xff]   ;;  %v2400_v10 = vld [vmem:[#allocation5 + $0x20] ss:$8 sps:$4 sm:$0xff]  }
  0x5f   : > { %1224 = vmatprep.subr.bf16.mxu0 %v2392_v5  ;;  %v2401_v11 = vld [vmem:[#allocation5 + $0x120] ss:$8 sps:$4 sm:$0xff]   ;;  %v2402_v12 = vld [vmem:[#allocation5 + $0x34] ss:$8 sps:$4 sm:$0xff]   ;;  %v2406_v14 = vld [vmem:[#allocation5 + $0x30] ss:$8 sps:$4 sm:$0xff]  }
  0x60   : > { %v2404_v13 = vld [vmem:[#allocation5 + $0x134] ss:$8 sps:$4 sm:$0xff]   ;;  %v2407_v15 = vld [vmem:[#allocation5 + $0x130] ss:$8 sps:$4 sm:$0xff]   ;;  %v2408_v16 = vld [vmem:[#allocation5 + $0x44] ss:$8 sps:$4 sm:$0xff]  }
  0x61   : > { %1032 = vmatpush1.bf16.msra.mxu1 %v2394_v6  ;;  %v2410_v17 = vld [vmem:[#allocation5 + $0x144] ss:$8 sps:$4 sm:$0xff]   ;;  %v2412_v18 = vld [vmem:[#allocation5 + $0x40] ss:$8 sps:$4 sm:$0xff]   ;;  %v2414_v20 = vld [vmem:[#allocation5 + $0x54] ss:$8 sps:$4 sm:$0xff]  }
  0x62   : > { %1225 = vmatpush1.bf16.msra.mxu0 %v2395_v7  ;;  %1033 = vmatprep.subr.bf16.mxu1 %v2396_v8  ;;  %v2413_v19 = vld [vmem:[#allocation5 + $0x140] ss:$8 sps:$4 sm:$0xff]   ;;  %v2416_v21 = vld [vmem:[#allocation5 + $0x154] ss:$8 sps:$4 sm:$0xff]   ;;  %v2418_v22 = vld [vmem:[#allocation5 + $0x50] ss:$8 sps:$4 sm:$0xff]  }
  0x63   : > { %1226 = vmatprep.subr.bf16.mxu0 %v2398_v9  ;;  %v2419_v23 = vld [vmem:[#allocation5 + $0x150] ss:$8 sps:$4 sm:$0xff]   ;;  %v2420_v24 = vld [vmem:[#allocation5 + $0x64] ss:$8 sps:$4 sm:$0xff]   ;;  %v2424_v26 = vld [vmem:[#allocation5 + $0x60] ss:$8 sps:$4 sm:$0xff]  }
  0x64   : > { %v2422_v25 = vld [vmem:[#allocation5 + $0x164] ss:$8 sps:$4 sm:$0xff]   ;;  %v2425_v27 = vld [vmem:[#allocation5 + $0x160] ss:$8 sps:$4 sm:$0xff]   ;;  %v2426_v28 = vld [vmem:[#allocation5 + $0x74] ss:$8 sps:$4 sm:$0xff]  }
  0x65   : > { %1034 = vmatpush1.bf16.msra.mxu1 %v2400_v10  ;;  %v2428_v29 = vld [vmem:[#allocation5 + $0x174] ss:$8 sps:$4 sm:$0xff]   ;;  %v2430_v30 = vld [vmem:[#allocation5 + $0x70] ss:$8 sps:$4 sm:$0xff]   ;;  %v2432_v32 = vld [vmem:[#allocation5 + $0x84] ss:$8 sps:$4 sm:$0xff]  }
  0x66   : > { %1227 = vmatpush1.bf16.msra.mxu0 %v2401_v11  ;;  %1035 = vmatprep.subr.bf16.mxu1 %v2402_v12  ;;  %v2431_v31 = vld [vmem:[#allocation5 + $0x170] ss:$8 sps:$4 sm:$0xff]   ;;  %v2434_v33 = vld [vmem:[#allocation5 + $0x184] ss:$8 sps:$4 sm:$0xff]   ;;  %v2436_v34 = vld [vmem:[#allocation5 + $0x80] ss:$8 sps:$4 sm:$0xff]  }
  0x67   : > { %1228 = vmatprep.subr.bf16.mxu0 %v2404_v13  ;;  %v2437_v35 = vld [vmem:[#allocation5 + $0x180] ss:$8 sps:$4 sm:$0xff]   ;;  %v2438_v36 = vld [vmem:[#allocation5 + $0x94] ss:$8 sps:$4 sm:$0xff]   ;;  %v2442_v38 = vld [vmem:[#allocation5 + $0x90] ss:$8 sps:$4 sm:$0xff]  }
  0x68   : > { %v2440_v37 = vld [vmem:[#allocation5 + $0x194] ss:$8 sps:$4 sm:$0xff]   ;;  %v2443_v39 = vld [vmem:[#allocation5 + $0x190] ss:$8 sps:$4 sm:$0xff]   ;;  %v2444_v40 = vld [vmem:[#allocation5 + $0xa4] ss:$8 sps:$4 sm:$0xff]  }
  0x69   : > { %1036 = vmatpush1.bf16.msra.mxu1 %v2406_v14  ;;  %v2446_v41 = vld [vmem:[#allocation5 + $0x1a4] ss:$8 sps:$4 sm:$0xff]   ;;  %v2448_v42 = vld [vmem:[#allocation5 + $0xa0] ss:$8 sps:$4 sm:$0xff]   ;;  %v2450_v44 = vld [vmem:[#allocation5 + $0xb4] ss:$8 sps:$4 sm:$0xff]  }
  0x6a   : > { %1229 = vmatpush1.bf16.msra.mxu0 %v2407_v15  ;;  %1037 = vmatprep.subr.bf16.mxu1 %v2408_v16  ;;  %v2449_v43 = vld [vmem:[#allocation5 + $0x1a0] ss:$8 sps:$4 sm:$0xff]   ;;  %v2452_v45 = vld [vmem:[#allocation5 + $0x1b4] ss:$8 sps:$4 sm:$0xff]   ;;  %v2454_v46 = vld [vmem:[#allocation5 + $0xb0] ss:$8 sps:$4 sm:$0xff]  }
  0x6b   : > { %1230 = vmatprep.subr.bf16.mxu0 %v2410_v17  ;;  %v2455_v47 = vld [vmem:[#allocation5 + $0x1b0] ss:$8 sps:$4 sm:$0xff]   ;;  %v2456_v48 = vld [vmem:[#allocation5 + $0xc4] ss:$8 sps:$4 sm:$0xff]   ;;  %v2460_v52 = vld [vmem:[#allocation5 + $0xc0] ss:$8 sps:$4 sm:$0xff]  }
  0x6c   : > { %v2482_v49 = vld [vmem:[%s3107_s29 + $0x4] ss:$16 sps:$4 sm:$0xff]   ;;  %v2485_v51 = vld [vmem:[%s3107_s29 + $0xc] ss:$16 sps:$4 sm:$0xff]   ;;  %v2461_v53 = vld [vmem:[#allocation5 + $0x1c0] ss:$8 sps:$4 sm:$0xff]  }
  0x6d   : > { %1038 = vmatpush1.bf16.msra.mxu1 %v2412_v18  ;;  %v2458_v50 = vld [vmem:[#allocation5 + $0x1c4] ss:$8 sps:$4 sm:$0xff]   ;;  %1061 = vmatprep.mubr.bf16.mxu1 %v2482_v49  ;;  %v2462_v54 = vld [vmem:[#allocation5 + $0xd4] ss:$8 sps:$4 sm:$0xff]   ;;  %v2466_v56 = vld [vmem:[#allocation5 + $0xd0] ss:$8 sps:$4 sm:$0xff]  }
  0x6e   : > { %1231 = vmatpush1.bf16.msra.mxu0 %v2413_v19  ;;  %1039 = vmatprep.subr.bf16.mxu1 %v2414_v20  ;;  %v2464_v55 = vld [vmem:[#allocation5 + $0x1d4] ss:$8 sps:$4 sm:$0xff]   ;;  %v2467_v57 = vld [vmem:[#allocation5 + $0x1d0] ss:$8 sps:$4 sm:$0xff]   ;;  %v2468_v58 = vld [vmem:[#allocation5 + $0xe4] ss:$8 sps:$4 sm:$0xff]  }
  0x6f   : > { %1232 = vmatprep.subr.bf16.mxu0 %v2416_v21  ;;  %1254 = vmatprep.mubr.bf16.mxu0 %v2485_v51  ;;  %v2470_v59 = vld [vmem:[#allocation5 + $0x1e4] ss:$8 sps:$4 sm:$0xff]   ;;  %v2472_v60 = vld [vmem:[#allocation5 + $0xe0] ss:$8 sps:$4 sm:$0xff]   ;;  %v2474_v62 = vld [vmem:[#allocation5 + $0xf4] ss:$8 sps:$4 sm:$0xff]  }
  0x70   : > { %v2473_v61 = vld [vmem:[#allocation5 + $0x1e0] ss:$8 sps:$4 sm:$0xff]   ;;  %v2476_v63 = vld [vmem:[#allocation5 + $0x1f4] ss:$8 sps:$4 sm:$0xff]   ;;  %v2478_v0 = vld [vmem:[#allocation5 + $0xf0] ss:$8 sps:$4 sm:$0xff]  }
  0x71   : > { %1040 = vmatpush1.bf16.msra.mxu1 %v2418_v22  ;;  %v2479_v1 = vld [vmem:[#allocation5 + $0x1f0] ss:$8 sps:$4 sm:$0xff]   ;;  %v2486_v4 = vld [vmem:[%s3107_s29 + $0x24] ss:$16 sps:$4 sm:$0xff]   ;;  %v2488_v5 = vld [vmem:[%s3107_s29 + $0x2c] ss:$16 sps:$4 sm:$0xff]  }
  0x72   : > { %1233 = vmatpush1.bf16.msra.mxu0 %v2419_v23  ;;  %1041 = vmatprep.subr.bf16.mxu1 %v2420_v24  ;;  %v2480_v2 = vld [vmem:[%s3107_s29] ss:$16 sps:$4 sm:$0xff]   ;;  %v2483_v3 = vld [vmem:[%s3107_s29 + $0x8] ss:$16 sps:$4 sm:$0xff]   ;;  %v2492_v8 = vld [vmem:[%s3107_s29 + $0x44] ss:$16 sps:$4 sm:$0xff]  }
  0x73   : > { %1234 = vmatprep.subr.bf16.mxu0 %v2422_v25  ;;  %v2490_v6 = vld [vmem:[%s3107_s29 + $0x20] ss:$16 sps:$4 sm:$0xff]   ;;  %v2491_v7 = vld [vmem:[%s3107_s29 + $0x28] ss:$16 sps:$4 sm:$0xff]   ;;  %v2494_v9 = vld [vmem:[%s3107_s29 + $0x4c] ss:$16 sps:$4 sm:$0xff]  }
  0x74   : > { %v2496_v10 = vld [vmem:[%s3107_s29 + $0x40] ss:$16 sps:$4 sm:$0xff]   ;;  %v2497_v11 = vld [vmem:[%s3107_s29 + $0x48] ss:$16 sps:$4 sm:$0xff]   ;;  %v2498_v12 = vld [vmem:[%s3107_s29 + $0x64] ss:$16 sps:$4 sm:$0xff]  }
  0x75   : > { %1042 = vmatpush1.bf16.msra.mxu1 %v2424_v26  ;;  %v2500_v13 = vld [vmem:[%s3107_s29 + $0x6c] ss:$16 sps:$4 sm:$0xff]   ;;  %v2502_v14 = vld [vmem:[%s3107_s29 + $0x60] ss:$16 sps:$4 sm:$0xff]   ;;  %v2503_v15 = vld [vmem:[%s3107_s29 + $0x68] ss:$16 sps:$4 sm:$0xff]  }
  0x76   : > { %1235 = vmatpush1.bf16.msra.mxu0 %v2425_v27  ;;  %1043 = vmatprep.subr.bf16.mxu1 %v2426_v28  ;;  %v2504_v16 = vld [vmem:[%s3107_s29 + $0x84] ss:$16 sps:$4 sm:$0xff]   ;;  %v2506_v17 = vld [vmem:[%s3107_s29 + $0x8c] ss:$16 sps:$4 sm:$0xff]   ;;  %v2508_v18 = vld [vmem:[%s3107_s29 + $0x80] ss:$16 sps:$4 sm:$0xff]  }
  0x77   : > { %1236 = vmatprep.subr.bf16.mxu0 %v2428_v29  ;;  %v2509_v19 = vld [vmem:[%s3107_s29 + $0x88] ss:$16 sps:$4 sm:$0xff]   ;;  %v2510_v20 = vld [vmem:[%s3107_s29 + $0xa4] ss:$16 sps:$4 sm:$0xff]   ;;  %v2512_v21 = vld [vmem:[%s3107_s29 + $0xac] ss:$16 sps:$4 sm:$0xff]  }
  0x78   : > { %v2514_v22 = vld [vmem:[%s3107_s29 + $0xa0] ss:$16 sps:$4 sm:$0xff]   ;;  %v2515_v23 = vld [vmem:[%s3107_s29 + $0xa8] ss:$16 sps:$4 sm:$0xff]   ;;  %v2516_v24 = vld [vmem:[%s3107_s29 + $0xc4] ss:$16 sps:$4 sm:$0xff]  }
  0x79   : > { %1044 = vmatpush1.bf16.msra.mxu1 %v2430_v30  ;;  %v2518_v25 = vld [vmem:[%s3107_s29 + $0xcc] ss:$16 sps:$4 sm:$0xff]   ;;  %v2520_v26 = vld [vmem:[%s3107_s29 + $0xc0] ss:$16 sps:$4 sm:$0xff]   ;;  %v2521_v27 = vld [vmem:[%s3107_s29 + $0xc8] ss:$16 sps:$4 sm:$0xff]  }
  0x7a   : > { %1237 = vmatpush1.bf16.msra.mxu0 %v2431_v31  ;;  %1045 = vmatprep.subr.bf16.mxu1 %v2432_v32  ;;  %v2522_v28 = vld [vmem:[%s3107_s29 + $0xe4] ss:$16 sps:$4 sm:$0xff]   ;;  %v2524_v29 = vld [vmem:[%s3107_s29 + $0xec] ss:$16 sps:$4 sm:$0xff]   ;;  %v2526_v30 = vld [vmem:[%s3107_s29 + $0xe0] ss:$16 sps:$4 sm:$0xff]  }
  0x7b   : > { %1238 = vmatprep.subr.bf16.mxu0 %v2434_v33  ;;  %v2527_v31 = vld [vmem:[%s3107_s29 + $0xe8] ss:$16 sps:$4 sm:$0xff]   ;;  %v2528_v32 = vld [vmem:[%s3107_s29 + $0x104] ss:$16 sps:$4 sm:$0xff]   ;;  %v2530_v33 = vld [vmem:[%s3107_s29 + $0x10c] ss:$16 sps:$4 sm:$0xff]  }
  0x7c   : > { %v2555_v49 = vld [vmem:[%s3107_s29 + $0x18c] ss:$16 sps:$4 sm:$0xff]   ;;  %v2557_v51 = vld [vmem:[%s3107_s29 + $0x188] ss:$16 sps:$4 sm:$0xff]   ;;  %s1944_s21 = sshll.u32 %s3103_s7, 1  ;;  %vm1786_vm1 = vcmask 1040384  }
  0x7d   : > { %1046 = vmatpush1.bf16.msra.mxu1 %v2436_v34  ;;  %v2532_v34 = vld [vmem:[%s3107_s29 + $0x100] ss:$16 sps:$4 sm:$0xff]   ;;  %s3424_s22 = scalar_lea.vmem [#allocation7], %s1944_s21  ;;  %s2111_s28 = sshll.u32 %s2908_s18, 5 }
  0x7e   : > { %1239 = vmatpush1.bf16.msra.mxu0 %v2437_v35  ;;  %1047 = vmatprep.subr.bf16.mxu1 %v2438_v36  ;;  %v2533_v35 = vld [vmem:[%s3107_s29 + $0x108] ss:$16 sps:$4 sm:$0xff]   ;;  %v2534_v36 = vld [vmem:[%s3107_s29 + $0x124] ss:$16 sps:$4 sm:$0xff]   ;;  %s1841_s13 = sshll.u32 %s3424_s22, 4  ;;  %s3445_s6 = scalar_lea.hbm %s3501_s4, %s2111_s28  ;;  %s3447_s13 = int_to_ptr.vmem [resolvable:$true] %s1841_s13 }
  0x7f   : > { %1240 = vmatprep.subr.bf16.mxu0 %v2440_v37  ;;  %v2537_v37 = vld [vmem:[%s3107_s29 + $0x12c] ss:$16 sps:$4 sm:$0xff]   ;;  %s1827_s9 = scalar_lea.sflag [#allocation4], %s3103_s7  ;;  %s2830_s11 = scalar_lea.vmem %s3447_s13, 32 }
  0x80   : > { %p2831_p4 = scmp.ne.s32.totalorder %s3447_s13, %s2830_s11  ;;  %s2925_s18 = smov [#allocation7]  }
  0x81   : > { %1048 = vmatpush1.bf16.msra.mxu1 %v2442_v38  ;;  %v2536_v38 = vld [vmem:[%s3107_s29 + $0x120] ss:$16 sps:$4 sm:$0xff]   ;;  %s2834_s12 = sshll.u32 %s2925_s18, 4  ;;  %s2835_s12 = int_to_ptr.vmem [resolvable:$false] %s2834_s12 }
  0x82   : > { %1241 = vmatpush1.bf16.msra.mxu0 %v2443_v39  ;;  %1049 = vmatprep.subr.bf16.mxu1 %v2444_v40  ;;  %v2539_v39 = vld [vmem:[%s3107_s29 + $0x128] ss:$16 sps:$4 sm:$0xff]   ;;  %v2540_v40 = vld [vmem:[%s3107_s29 + $0x144] ss:$16 sps:$4 sm:$0xff]   ;;  %p2832_p6 = pnand %p2831_p4, %p3047_p10  ;;  %p2837_p12 = scmp.lt.s32.totalorder %s3447_s13, %s2835_s12 }
  0x83   : > { %1242 = vmatprep.subr.bf16.mxu0 %v2446_v41  ;;  %v2543_v41 = vld [vmem:[%s3107_s29 + $0x14c] ss:$16 sps:$4 sm:$0xff]  }
  0x84   : > { %p2833_p8 = pneg %p2832_p6 }
  0x85   : > { %1050 = vmatpush1.bf16.msra.mxu1 %v2448_v42  ;;  %v2542_v42 = vld [vmem:[%s3107_s29 + $0x140] ss:$16 sps:$4 sm:$0xff]  }
  0x86   : > { %1243 = vmatpush1.bf16.msra.mxu0 %v2449_v43  ;;  %1051 = vmatprep.subr.bf16.mxu1 %v2450_v44  ;;  %v2545_v43 = vld [vmem:[%s3107_s29 + $0x148] ss:$16 sps:$4 sm:$0xff]   ;;  %v2546_v44 = vld [vmem:[%s3107_s29 + $0x164] ss:$16 sps:$4 sm:$0xff]  }
  0x87   : > { %1244 = vmatprep.subr.bf16.mxu0 %v2452_v45  ;;  %v2549_v45 = vld [vmem:[%s3107_s29 + $0x16c] ss:$16 sps:$4 sm:$0xff]  }
  0x89   : > { %1052 = vmatpush1.bf16.msra.mxu1 %v2454_v46  ;;  %v2548_v46 = vld [vmem:[%s3107_s29 + $0x160] ss:$16 sps:$4 sm:$0xff]  }
  0x8a   : > { %1245 = vmatpush1.bf16.msra.mxu0 %v2455_v47  ;;  %1053 = vmatprep.subr.bf16.mxu1 %v2456_v48  ;;  %v2551_v47 = vld [vmem:[%s3107_s29 + $0x168] ss:$16 sps:$4 sm:$0xff]   ;;  %v2552_v48 = vld [vmem:[%s3107_s29 + $0x184] ss:$16 sps:$4 sm:$0xff]  }
  0x8b   : > { %1246 = vmatprep.subr.bf16.mxu0 %v2458_v50  ;;  %v2554_v50 = vld [vmem:[%s3107_s29 + $0x180] ss:$16 sps:$4 sm:$0xff]  }
  0x8d   : > { %1054 = vmatpush1.bf16.msra.mxu1 %v2460_v52  ;;  %v2558_v52 = vld [vmem:[%s3107_s29 + $0x1a4] ss:$16 sps:$4 sm:$0xff]  }
  0x8e   : > { %1247 = vmatpush1.bf16.msra.mxu0 %v2461_v53  ;;  %1055 = vmatprep.subr.bf16.mxu1 %v2462_v54  ;;  %v2561_v53 = vld [vmem:[%s3107_s29 + $0x1ac] ss:$16 sps:$4 sm:$0xff]   ;;  %v2560_v54 = vld [vmem:[%s3107_s29 + $0x1a0] ss:$16 sps:$4 sm:$0xff]  }
  0x8f   : > { %1248 = vmatprep.subr.bf16.mxu0 %v2464_v55  ;;  %v2563_v55 = vld [vmem:[%s3107_s29 + $0x1a8] ss:$16 sps:$4 sm:$0xff]  }
  0x91   : > { %1056 = vmatpush1.bf16.msra.mxu1 %v2466_v56  ;;  %v2564_v56 = vld [vmem:[%s3107_s29 + $0x1c4] ss:$16 sps:$4 sm:$0xff]  }
  0x92   : > { %1249 = vmatpush1.bf16.msra.mxu0 %v2467_v57  ;;  %1057 = vmatprep.subr.bf16.mxu1 %v2468_v58  ;;  %v2567_v57 = vld [vmem:[%s3107_s29 + $0x1cc] ss:$16 sps:$4 sm:$0xff]   ;;  %v2566_v58 = vld [vmem:[%s3107_s29 + $0x1c0] ss:$16 sps:$4 sm:$0xff]  }
  0x93   : > { %1250 = vmatprep.subr.bf16.mxu0 %v2470_v59  ;;  %v2569_v59 = vld [vmem:[%s3107_s29 + $0x1c8] ss:$16 sps:$4 sm:$0xff]  }
  0x95   : > { %1058 = vmatpush1.bf16.msra.mxu1 %v2472_v60  ;;  %v2570_v60 = vld [vmem:[%s3107_s29 + $0x1e4] ss:$16 sps:$4 sm:$0xff]  }
  0x96   : > { %1251 = vmatpush1.bf16.msra.mxu0 %v2473_v61  ;;  %1059 = vmatprep.subr.bf16.mxu1 %v2474_v62  ;;  %v2573_v61 = vld [vmem:[%s3107_s29 + $0x1ec] ss:$16 sps:$4 sm:$0xff]   ;;  %v2572_v62 = vld [vmem:[%s3107_s29 + $0x1e0] ss:$16 sps:$4 sm:$0xff]  }
  0x97   : > { %1252 = vmatprep.subr.bf16.mxu0 %v2476_v63  ;;  %v2575_v63 = vld [vmem:[%s3107_s29 + $0x1e8] ss:$16 sps:$4 sm:$0xff]   ;;  %s2836_s29 = scalar_lea.vmem %s2835_s12, 64 }
  0x98   : > { %p2838_p11 = scmp.lt.s32.totalorder %s2836_s29, %s2830_s11 }
  0x99   : > { %1060 = vmatpush1.bf16.msra.mxu1 %v2478_v0  ;;  %v379_v0 = vlaneseq }
  0x9a   : > { %1253 = vmatpush1.bf16.msra.mxu0 %v2479_v1  ;;  %p2839_p0 = por %p2838_p11, %p2837_p12 }
  0x9b   : > { %v3182_v1 = vshrl.u32 %v379_v0, 7  ;;  %vm3420_vm0 = vcmp.lt.s32.totalorder %v379_v0, 256 }
  0x9c   : > { %1062 = vmatmul.mubr.bf16.vlgmr.msra.gmra.mrb[0].mxu1 %v2480_v2  ;;  %p2840_p5 = pnand %p2839_p0, %p2833_p8 }
  0x9d   : > { %1255 = vmatmul.mubr.bf16.vlgmr.msra.gmra.mrb[0].mxu0 %v2483_v3  ;;  %1071 = vmatprep.mubr.bf16.mxu1 %v2486_v4  ;;  %v3185_v2 = vsub.s32 0, %v3182_v1  ;;  %v377_v3 = vld [vmem:[%s3499_s2] sm:$0x3]  ;;  %v3191_v4 = vsub.s32 1, %v3182_v1 }
  0x9e   : > { %1264 = vmatprep.mubr.bf16.mxu0 %v2488_v5 }
  0x9f   : > { %v3194_v5 = vrot.slane %v377_v3, %v3185_v2 }
  0xa4   : > { %1072 = vmatmul.mubr.bf16.gmra.mrb[4].mxu1 %v2490_v6  ;;  %v3197_v6 = vrot.slane %v377_v3, %v3191_v4 }
  0xa5   : > { %1265 = vmatmul.mubr.bf16.gmra.mrb[4].mxu0 %v2491_v7  ;;  %1081 = vmatprep.mubr.bf16.mxu1 %v2492_v8 }
  0xa6   : > { %1274 = vmatprep.mubr.bf16.mxu0 %v2494_v9 }
  0xac   : > { %1082 = vmatmul.mubr.bf16.gmra.mrb[8].mxu1 %v2496_v10 }
  0xad   : > { %1275 = vmatmul.mubr.bf16.gmra.mrb[8].mxu0 %v2497_v11  ;;  %1091 = vmatprep.mubr.bf16.mxu1 %v2498_v12 }
  0xae   : > { %1284 = vmatprep.mubr.bf16.mxu0 %v2500_v13 }
  0xb4   : > { %1092 = vmatmul.mubr.bf16.gmra.mrb[12].mxu1 %v2502_v14 }
  0xb5   : > { %1285 = vmatmul.mubr.bf16.gmra.mrb[12].mxu0 %v2503_v15  ;;  %1101 = vmatprep.mubr.bf16.mxu1 %v2504_v16 }
  0xb6   : > { %1294 = vmatprep.mubr.bf16.mxu0 %v2506_v17 }
  0xbc   : > { %1102 = vmatmul.mubr.bf16.gmra.mrb[16].mxu1 %v2508_v18 }
  0xbd   : > { %1295 = vmatmul.mubr.bf16.gmra.mrb[16].mxu0 %v2509_v19  ;;  %1111 = vmatprep.mubr.bf16.mxu1 %v2510_v20 }
  0xbe   : > { %1304 = vmatprep.mubr.bf16.mxu0 %v2512_v21 }
  0xc4   : > { %1112 = vmatmul.mubr.bf16.gmra.mrb[20].mxu1 %v2514_v22 }
  0xc5   : > { %1305 = vmatmul.mubr.bf16.gmra.mrb[20].mxu0 %v2515_v23  ;;  %1121 = vmatprep.mubr.bf16.mxu1 %v2516_v24 }
  0xc6   : > { %1314 = vmatprep.mubr.bf16.mxu0 %v2518_v25 }
  0xcc   : > { %1122 = vmatmul.mubr.bf16.gmra.mrb[24].mxu1 %v2520_v26 }
  0xcd   : > { %1315 = vmatmul.mubr.bf16.gmra.mrb[24].mxu0 %v2521_v27  ;;  %1131 = vmatprep.mubr.bf16.mxu1 %v2522_v28 }
  0xce   : > { %1324 = vmatprep.mubr.bf16.mxu0 %v2524_v29 }
  0xd4   : > { %1132 = vmatmul.mubr.bf16.gmra.mrb[28].mxu1 %v2526_v30 }
  0xd5   : > { %1325 = vmatmul.mubr.bf16.gmra.mrb[28].mxu0 %v2527_v31  ;;  %1141 = vmatprep.mubr.bf16.mxu1 %v2528_v32 }
  0xd6   : > { %1334 = vmatprep.mubr.bf16.mxu0 %v2530_v33 }
  0xdc   : > { %1142 = vmatmul.mubr.bf16.gmra.mrb[32].mxu1 %v2532_v34 }
  0xdd   : > { %1335 = vmatmul.mubr.bf16.gmra.mrb[32].mxu0 %v2533_v35  ;;  %1151 = vmatprep.mubr.bf16.mxu1 %v2534_v36 }
  0xde   : > { %1344 = vmatprep.mubr.bf16.mxu0 %v2537_v37 }
  0xe4   : > { %1152 = vmatmul.mubr.bf16.gmra.mrb[36].mxu1 %v2536_v38 }
  0xe5   : > { %1345 = vmatmul.mubr.bf16.gmra.mrb[36].mxu0 %v2539_v39  ;;  %1161 = vmatprep.mubr.bf16.mxu1 %v2540_v40 }
  0xe6   : > { %1354 = vmatprep.mubr.bf16.mxu0 %v2543_v41 }
  0xec   : > { %1162 = vmatmul.mubr.bf16.gmra.mrb[40].mxu1 %v2542_v42 }
  0xed   : > { %1355 = vmatmul.mubr.bf16.gmra.mrb[40].mxu0 %v2545_v43  ;;  %1171 = vmatprep.mubr.bf16.mxu1 %v2546_v44 }
  0xee   : > { %1364 = vmatprep.mubr.bf16.mxu0 %v2549_v45 }
  0xf4   : > { %1172 = vmatmul.mubr.bf16.gmra.mrb[44].mxu1 %v2548_v46 }
  0xf5   : > { %1365 = vmatmul.mubr.bf16.gmra.mrb[44].mxu0 %v2551_v47  ;;  %1181 = vmatprep.mubr.bf16.mxu1 %v2552_v48 }
  0xf6   : > { %1374 = vmatprep.mubr.bf16.mxu0 %v2555_v49 }
  0xfc   : > { %1182 = vmatmul.mubr.bf16.gmra.mrb[48].mxu1 %v2554_v50 }
  0xfd   : > { %1375 = vmatmul.mubr.bf16.gmra.mrb[48].mxu0 %v2557_v51  ;;  %1191 = vmatprep.mubr.bf16.mxu1 %v2558_v52 }
  0xfe   : > { %1384 = vmatprep.mubr.bf16.mxu0 %v2561_v53 }
 0x104   : > { %1192 = vmatmul.mubr.bf16.gmra.mrb[52].mxu1 %v2560_v54 }
 0x105   : > { %1385 = vmatmul.mubr.bf16.gmra.mrb[52].mxu0 %v2563_v55  ;;  %1201 = vmatprep.mubr.bf16.mxu1 %v2564_v56 }
 0x106   : > { %1394 = vmatprep.mubr.bf16.mxu0 %v2567_v57 }
 0x10c   : > { %1202 = vmatmul.mubr.bf16.gmra.mrb[56].mxu1 %v2566_v58 }
 0x10d   : > { %1395 = vmatmul.mubr.bf16.gmra.mrb[56].mxu0 %v2569_v59  ;;  %1211 = vmatprep.mubr.bf16.mxu1 %v2570_v60 }
 0x10e   : > { %1404 = vmatprep.mubr.bf16.mxu0 %v2573_v61 }
 0x114   : > { %1212 = vmatmul.mubr.bf16.gmra.mrb[60].mxu1 %v2572_v62 }
 0x115   : > { %1405 = vmatmul.mubr.bf16.gmra.mrb[60].mxu0 %v2575_v63 }
 0x16f   : > { %v1063_v7 = vpop.f32.mrb[0].mxu1 }
 0x170   : > { %v1256_v8 = vpop.f32.mrb[0].mxu0  ;;  %v1064_v9 = vadd.f32 %v1063_v7, %v3194_v5  ;;  %v1065_v10 = vpop.f32.mrb[1].mxu1 }
 0x171   : > { %v1258_v11 = vpop.f32.mrb[1].mxu0  ;;  %v1066_v12 = vadd.f32 %v1065_v10, %v3197_v6  ;;  %v1067_v13 = vpop.f32.mrb[2].mxu1 }
 0x172   : > { %v1260_v14 = vpop.f32.mrb[2].mxu0  ;;  %v1257_v15 = vadd.f32 %v1256_v8, %v1064_v9  ;;  %v1068_v16 = vadd.f32 %v1067_v13, %v3194_v5  ;;  %v1069_v17 = vpop.f32.mrb[3].mxu1 }
 0x173   : > { %v1262_v18 = vpop.f32.mrb[3].mxu0  ;;  %v1259_v19 = vadd.f32 %v1258_v11, %v1066_v12  ;;  %v1070_v20 = vadd.f32 %v1069_v17, %v3197_v6 }
 0x174   : > { %v1261_v21 = vadd.f32 %v1260_v14, %v1068_v16 }
 0x175   : > { %v2073_v22 = vmul.f32 -1.442695, %v1259_v19  ;;  %v1263_v23 = vadd.f32 %v1262_v18, %v1070_v20 }
 0x177   : > { %2576 = vpow2.f32 %v2073_v22  ;;  %v2074_v24 = vmul.f32 -1.442695, %v1263_v23  ;;  %v1073_v25 = vpop.f32.mrb[4].mxu1 }
 0x178   : > { %v1266_v26 = vpop.f32.mrb[4].mxu0  ;;  %v1074_v27 = vadd.f32 %v1073_v25, %v3194_v5  ;;  %v1075_v28 = vpop.f32.mrb[5].mxu1 }
 0x179   : > { %v1268_v29 = vpop.f32.mrb[5].mxu0  ;;  %2578 = vpow2.f32 %v2074_v24  ;;  %v1076_v30 = vadd.f32 %v1075_v28, %v3197_v6  ;;  %v1077_v31 = vpop.f32.mrb[6].mxu1 }
 0x17a   : > { %v1270_v32 = vpop.f32.mrb[6].mxu0  ;;  %v1267_v33 = vadd.f32 %v1266_v26, %v1074_v27  ;;  %v1078_v34 = vadd.f32 %v1077_v31, %v3194_v5  ;;  %v1079_v35 = vpop.f32.mrb[7].mxu1 }
 0x17b   : > { %v1272_v36 = vpop.f32.mrb[7].mxu0  ;;  %v1269_v37 = vadd.f32 %v1268_v29, %v1076_v30  ;;  %v1080_v38 = vadd.f32 %v1079_v35, %v3197_v6  ;;  %v3226_v30 = vld [vmem:[%s3500_s3] sm:$0x1] }
 0x17c   : > { %v1271_v39 = vadd.f32 %v1270_v32, %v1078_v34  ;;  %2144 = vmatprep.mubr.f32.mxu1 %v3226_v30 }
 0x17d   : > { %v2075_v40 = vmul.f32 -1.442695, %v1269_v37  ;;  %v1273_v41 = vadd.f32 %v1272_v36, %v1080_v38 }
 0x17f   : > { %2580 = vpow2.f32 %v2075_v40  ;;  %v2076_v42 = vmul.f32 -1.442695, %v1273_v41  ;;  %v1083_v43 = vpop.f32.mrb[8].mxu1 }
 0x180   : > { %v1276_v44 = vpop.f32.mrb[8].mxu0  ;;  %v1084_v45 = vadd.f32 %v1083_v43, %v3194_v5  ;;  %v1085_v46 = vpop.f32.mrb[9].mxu1 }
 0x181   : > { %v1278_v47 = vpop.f32.mrb[9].mxu0  ;;  %v2577_v48 = vpop.eup %2576  ;;  %2582 = vpow2.f32 %v2076_v42  ;;  %v1086_v49 = vadd.f32 %v1085_v46, %v3197_v6 }
 0x182   : > { %v1087_v50 = vpop.f32.mrb[10].mxu1  ;;  %v1280_v51 = vpop.f32.mrb[10].mxu0  ;;  %v1543_v52 = vadd.f32 1.0, %v2577_v48  ;;  %v3209_v53 = vadd.f32 %v1276_v44, %v1084_v45  ;;  %2584 = vtanh.f32 %v1257_v15 }
 0x183   : > { %v1088_v54 = vadd.f32 %v1087_v50, %v3194_v5  ;;  %v1089_v55 = vpop.f32.mrb[11].mxu1  ;;  %v1282_v56 = vpop.f32.mrb[11].mxu0  ;;  %v1279_v58 = vadd.f32 %v1278_v47, %v1086_v49 }
 0x184   : > { %v2579_v57 = vpop.eup %2578  ;;  %v1090_v59 = vadd.f32 %v1089_v55, %v3197_v6  ;;  %2586 = vrcp.f32 %v1543_v52 }
 0x185   : > { %v1544_v60 = vadd.f32 1.0, %v2579_v57  ;;  %v3213_v61 = vadd.f32 %v1280_v51, %v1088_v54  ;;  %2588 = vtanh.f32 %v1261_v21  ;;  %v2077_v62 = vmul.f32 -1.442695, %v1279_v58 }
 0x186   : > { %v1283_v63 = vadd.f32 %v1282_v56, %v1090_v59 }
 0x187   : > { %2590 = vrcp.f32 %v1544_v60  ;;  %v1093_v7 = vpop.f32.mrb[12].mxu1 }
 0x188   : > { %2592 = vpow2.f32 %v2077_v62  ;;  %v2078_v3 = vmul.f32 -1.442695, %v1283_v63  ;;  %v1286_v8 = vpop.f32.mrb[12].mxu0  ;;  %v1094_v9 = vadd.f32 %v1093_v7, %v3194_v5  ;;  %v1095_v10 = vpop.f32.mrb[13].mxu1 }
 0x189   : > { %v1288_v11 = vpop.f32.mrb[13].mxu0  ;;  %v2581_v12 = vpop.eup %2580  ;;  %v1096_v13 = vadd.f32 %v1095_v10, %v3197_v6 }
 0x18a   : > { %2594 = vpow2.f32 %v2078_v3  ;;  %v1097_v14 = vpop.f32.mrb[14].mxu1  ;;  %v1290_v15 = vpop.f32.mrb[14].mxu0  ;;  %v1545_v16 = vadd.f32 1.0, %v2581_v12  ;;  %v3217_v17 = vadd.f32 %v1286_v8, %v1094_v9 }
 0x18b   : > { %v1098_v18 = vadd.f32 %v1097_v14, %v3194_v5  ;;  %v1099_v19 = vpop.f32.mrb[15].mxu1  ;;  %v1292_v20 = vpop.f32.mrb[15].mxu0  ;;  %2596 = vtanh.f32 %v1267_v33  ;;  %v1289_v22 = vadd.f32 %v1288_v11, %v1096_v13 }
 0x18c   : > { %v2583_v21 = vpop.eup %2582  ;;  %v1100_v23 = vadd.f32 %v1099_v19, %v3197_v6  ;;  %2598 = vrcp.f32 %v1545_v16 }
 0x18d   : > { %v1546_v24 = vadd.f32 1.0, %v2583_v21  ;;  %v3221_v25 = vadd.f32 %v1290_v15, %v1098_v18  ;;  %v2585_v26 = vpop.eup %2584  ;;  %2600 = vtanh.f32 %v1271_v39  ;;  %v2079_v27 = vmul.f32 -1.442695, %v1289_v22 }
 0x18e   : > { %v1293_v28 = vadd.f32 %v1292_v20, %v1100_v23  ;;  %v2587_v29 = vpop.eup %2586 }
 0x18f   : > { %2602 = vrcp.f32 %v1546_v24  ;;  %v2589_v31 = vpop.eup %2588  ;;  %v1103_v33 = vpop.f32.mrb[16].mxu1  ;;  %v3228_v35 = vmul.f32 %v2587_v29, %v2585_v26 }
 0x190   : > { %2604 = vpow2.f32 %v2079_v27  ;;  %v2080_v32 = vmul.f32 -1.442695, %v1293_v28  ;;  %v1296_v34 = vpop.f32.mrb[16].mxu0  ;;  %v1104_v37 = vadd.f32 %v1103_v33, %v3194_v5  ;;  %v1105_v38 = vpop.f32.mrb[17].mxu1 }
 0x191   : > { %v2591_v36 = vpop.eup %2590  ;;  %v1298_v39 = vpop.f32.mrb[17].mxu0  ;;  %v1106_v41 = vadd.f32 %v1105_v38, %v3197_v6 }
 0x192   : > { %v2593_v40 = vpop.eup %2592  ;;  %2606 = vpow2.f32 %v2080_v32  ;;  %v1107_v42 = vpop.f32.mrb[18].mxu1  ;;  %v3233_v44 = vmul.f32 %v2591_v36, %v2589_v31  ;;  %v3235_v46 = vadd.f32 %v1296_v34, %v1104_v37 }
 0x193   : > { %v1300_v43 = vpop.f32.mrb[18].mxu0  ;;  %v1547_v45 = vadd.f32 1.0, %v2593_v40  ;;  %v1108_v47 = vadd.f32 %v1107_v42, %v3194_v5  ;;  %v1109_v48 = vpop.f32.mrb[19].mxu1  ;;  %2608 = vtanh.f32 %v3209_v53  ;;  %v1299_v51 = vadd.f32 %v1298_v39, %v1106_v41 }
 0x194   : > { %v1302_v49 = vpop.f32.mrb[19].mxu0  ;;  %v2595_v50 = vpop.eup %2594  ;;  %v1110_v52 = vadd.f32 %v1109_v48, %v3197_v6  ;;  %v2148_v54 = vpack.c.bf16 %v3233_v44, %v3228_v35 }
 0x195   : > { %2610 = vrcp.f32 %v1547_v45  ;;  %v1548_v55 = vadd.f32 1.0, %v2595_v50  ;;  %v3242_v56 = vadd.f32 %v1300_v43, %v1108_v47  ;;  %v2597_v57 = vpop.eup %2596  ;;  %v2081_v58 = vmul.f32 -1.442695, %v1299_v51 }
 0x196   : > { %2612 = vtanh.f32 %v3213_v61  ;;  %v1303_v59 = vadd.f32 %v1302_v49, %v1110_v52  ;;  %v2599_v60 = vpop.eup %2598 }
 0x197   : > { %2614 = vrcp.f32 %v1548_v55  ;;  %v2601_v62 = vpop.eup %2600  ;;  %v1113_v63 = vpop.f32.mrb[20].mxu1  ;;  %v3245_v7 = vmul.f32 %v2599_v60, %v2597_v57 }
 0x198   : > { %2616 = vpow2.f32 %v2081_v58  ;;  %v2082_v53 = vmul.f32 -1.442695, %v1303_v59  ;;  %v1306_v3 = vpop.f32.mrb[20].mxu0  ;;  %v1114_v9 = vadd.f32 %v1113_v63, %v3194_v5  ;;  %v1115_v10 = vpop.f32.mrb[21].mxu1 }
 0x199   : > { %v2603_v8 = vpop.eup %2602  ;;  %v1308_v11 = vpop.f32.mrb[21].mxu0  ;;  %v1116_v61 = vadd.f32 %v1115_v10, %v3197_v6 }
 0x19a   : > { %v2605_v12 = vpop.eup %2604  ;;  %2618 = vpow2.f32 %v2082_v53  ;;  %v1117_v13 = vpop.f32.mrb[22].mxu1  ;;  %v3249_v15 = vmul.f32 %v2603_v8, %v2601_v62  ;;  %v3251_v18 = vadd.f32 %v1306_v3, %v1114_v9 }
 0x19b   : > { %v1310_v14 = vpop.f32.mrb[22].mxu0  ;;  %v1549_v16 = vadd.f32 1.0, %v2605_v12  ;;  %v1118_v19 = vadd.f32 %v1117_v13, %v3194_v5  ;;  %v1119_v20 = vpop.f32.mrb[23].mxu1  ;;  %2620 = vtanh.f32 %v3217_v17  ;;  %v1309_v23 = vadd.f32 %v1308_v11, %v1116_v61 }
 0x19c   : > { %v1312_v21 = vpop.f32.mrb[23].mxu0  ;;  %v2607_v22 = vpop.eup %2606  ;;  %v1120_v24 = vadd.f32 %v1119_v20, %v3197_v6  ;;  %v2152_v26 = vpack.c.bf16 %v3249_v15, %v3245_v7 }
 0x19d   : > { %2622 = vrcp.f32 %v1549_v16  ;;  %v1550_v27 = vadd.f32 1.0, %v2607_v22  ;;  %v3258_v28 = vadd.f32 %v1310_v14, %v1118_v19  ;;  %v2609_v29 = vpop.eup %2608  ;;  %v2083_v31 = vmul.f32 -1.442695, %v1309_v23 }
 0x19e   : > { %2624 = vtanh.f32 %v3221_v25  ;;  %v1313_v32 = vadd.f32 %v1312_v21, %v1120_v24 }
 0x19f   : > { %v2611_v33 = vpop.eup %2610  ;;  %2626 = vrcp.f32 %v1550_v27  ;;  %v1123_v36 = vpop.f32.mrb[24].mxu1 }
 0x1a0   : > { %v2613_v34 = vpop.eup %2612  ;;  %2628 = vpow2.f32 %v2083_v31  ;;  %v2084_v17 = vmul.f32 -1.442695, %v1313_v32  ;;  %v1316_v37 = vpop.f32.mrb[24].mxu0  ;;  %v3261_v38 = vmul.f32 %v2611_v33, %v2609_v29  ;;  %v1124_v40 = vadd.f32 %v1123_v36, %v3194_v5 }
 0x1a1   : > { %v2615_v39 = vpop.eup %2614  ;;  %v1125_v41 = vpop.f32.mrb[25].mxu1 }
 0x1a2   : > { %v1318_v42 = vpop.f32.mrb[25].mxu0  ;;  %v2617_v43 = vpop.eup %2616  ;;  %2630 = vpow2.f32 %v2084_v17  ;;  %v1126_v25 = vadd.f32 %v1125_v41, %v3197_v6  ;;  %v3265_v48 = vmul.f32 %v2615_v39, %v2613_v34  ;;  %v3267_v50 = vadd.f32 %v1316_v37, %v1124_v40 }
 0x1a3   : > { %v1127_v45 = vpop.f32.mrb[26].mxu1  ;;  %v1320_v47 = vpop.f32.mrb[26].mxu0  ;;  %v1551_v49 = vadd.f32 1.0, %v2617_v43  ;;  %2632 = vtanh.f32 %v3235_v46 }
 0x1a4   : > { %v1128_v51 = vadd.f32 %v1127_v45, %v3194_v5  ;;  %v1129_v52 = vpop.f32.mrb[27].mxu1  ;;  %v1322_v55 = vpop.f32.mrb[27].mxu0  ;;  %v1319_v58 = vadd.f32 %v1318_v42, %v1126_v25  ;;  %v2156_v60 = vpack.c.bf16 %v3265_v48, %v3261_v38 }
 0x1a5   : > { %v2619_v57 = vpop.eup %2618  ;;  %v1130_v59 = vadd.f32 %v1129_v52, %v3197_v6  ;;  %2634 = vrcp.f32 %v1551_v49 }
 0x1a6   : > { %v1552_v62 = vadd.f32 1.0, %v2619_v57  ;;  %v3274_v53 = vadd.f32 %v1320_v47, %v1128_v51  ;;  %v2621_v63 = vpop.eup %2620  ;;  %2636 = vtanh.f32 %v3242_v56  ;;  %v2085_v3 = vmul.f32 -1.442695, %v1319_v58 }
 0x1a7   : > { %v1323_v8 = vadd.f32 %v1322_v55, %v1130_v59  ;;  %v2623_v9 = vpop.eup %2622  ;;  %v1133_v11 = vpop.f32.mrb[28].mxu1 }
 0x1a8   : > { %2638 = vrcp.f32 %v1552_v62  ;;  %v2625_v10 = vpop.eup %2624  ;;  %v1326_v12 = vpop.f32.mrb[28].mxu0  ;;  %v3277_v61 = vmul.f32 %v2623_v9, %v2621_v63  ;;  %v1134_v14 = vadd.f32 %v1133_v11, %v3194_v5 }
 0x1a9   : > { %2640 = vpow2.f32 %v2085_v3  ;;  %v2086_v46 = vmul.f32 -1.442695, %v1323_v8  ;;  %v2627_v13 = vpop.eup %2626  ;;  %v1135_v16 = vpop.f32.mrb[29].mxu1 }
 0x1aa   : > { %v1328_v19 = vpop.f32.mrb[29].mxu0  ;;  %v2629_v20 = vpop.eup %2628  ;;  %v1136_v56 = vadd.f32 %v1135_v16, %v3197_v6  ;;  %v3281_v23 = vmul.f32 %v2627_v13, %v2625_v10  ;;  %v3283_v27 = vadd.f32 %v1326_v12, %v1134_v14 }
 0x1ab   : > { %2642 = vpow2.f32 %v2086_v46  ;;  %v1137_v21 = vpop.f32.mrb[30].mxu1  ;;  %v1330_v22 = vpop.f32.mrb[30].mxu0  ;;  %v1553_v24 = vadd.f32 1.0, %v2629_v20 }
 0x1ac   : > { %v1138_v29 = vadd.f32 %v1137_v21, %v3194_v5  ;;  %v1139_v31 = vpop.f32.mrb[31].mxu1  ;;  %v1332_v32 = vpop.f32.mrb[31].mxu0  ;;  %2644 = vtanh.f32 %v3251_v18  ;;  %v1329_v34 = vadd.f32 %v1328_v19, %v1136_v56  ;;  %v2160_v36 = vpack.c.bf16 %v3281_v23, %v3277_v61 }
 0x1ad   : > { %v2631_v33 = vpop.eup %2630  ;;  %v1140_v17 = vadd.f32 %v1139_v31, %v3197_v6  ;;  %2646 = vrcp.f32 %v1553_v24 }
 0x1ae   : > { %v1554_v37 = vadd.f32 1.0, %v2631_v33  ;;  %v3290_v39 = vadd.f32 %v1330_v22, %v1138_v29  ;;  %v2633_v40 = vpop.eup %2632  ;;  %2648 = vtanh.f32 %v3258_v28  ;;  %v2087_v41 = vmul.f32 -1.442695, %v1329_v34 }
 0x1af   : > { %v1333_v42 = vadd.f32 %v1332_v32, %v1140_v17  ;;  %v2635_v43 = vpop.eup %2634  ;;  %v1143_v45 = vpop.f32.mrb[32].mxu1 }
 0x1b0   : > { %2650 = vrcp.f32 %v1554_v37  ;;  %v2637_v25 = vpop.eup %2636  ;;  %v1336_v47 = vpop.f32.mrb[32].mxu0  ;;  %v3293_v49 = vmul.f32 %v2635_v43, %v2633_v40  ;;  %v1144_v52 = vadd.f32 %v1143_v45, %v3194_v5 }
 0x1b1   : > { %2652 = vpow2.f32 %v2087_v41  ;;  %v2088_v18 = vmul.f32 -1.442695, %v1333_v42  ;;  %v1145_v55 = vpop.f32.mrb[33].mxu1  ;;  %v1338_v57 = vpop.f32.mrb[33].mxu0 }
 0x1b2   : > { %v2639_v51 = vpop.eup %2638  ;;  %v1146_v28 = vadd.f32 %v1145_v55, %v3197_v6  ;;  %v1147_v59 = vpop.f32.mrb[34].mxu1  ;;  %v3299_v8 = vadd.f32 %v1336_v47, %v1144_v52 }
 0x1b3   : > { %v2641_v58 = vpop.eup %2640  ;;  %2654 = vpow2.f32 %v2088_v18  ;;  %v1340_v62 = vpop.f32.mrb[34].mxu0  ;;  %v3297_v63 = vmul.f32 %v2639_v51, %v2637_v25  ;;  %v1148_v9 = vadd.f32 %v1147_v59, %v3194_v5 }
 0x1b4   : > { %v1555_v3 = vadd.f32 1.0, %v2641_v58  ;;  %v1149_v10 = vpop.f32.mrb[35].mxu1  ;;  %v1342_v46 = vpop.f32.mrb[35].mxu0  ;;  %2656 = vtanh.f32 %v3267_v50  ;;  %v1339_v12 = vadd.f32 %v1338_v57, %v1146_v28 }
 0x1b5   : > { %v2643_v11 = vpop.eup %2642  ;;  %v1150_v13 = vadd.f32 %v1149_v10, %v3197_v6  ;;  %v2164_v14 = vpack.c.bf16 %v3297_v63, %v3293_v49  ;;  %v3306_v19 = vadd.f32 %v1340_v62, %v1148_v9 }
 0x1b6   : > { %2658 = vrcp.f32 %v1555_v3  ;;  %v1556_v16 = vadd.f32 1.0, %v2643_v11  ;;  %v2645_v20 = vpop.eup %2644  ;;  %v2089_v56 = vmul.f32 -1.442695, %v1339_v12 }
 0x1b7   : > { %2660 = vtanh.f32 %v3274_v53  ;;  %v1343_v21 = vadd.f32 %v1342_v46, %v1150_v13  ;;  %v2647_v22 = vpop.eup %2646  ;;  %v1153_v29 = vpop.f32.mrb[36].mxu1 }
 0x1b8   : > { %2662 = vrcp.f32 %v1556_v16  ;;  %v2649_v24 = vpop.eup %2648  ;;  %v1346_v31 = vpop.f32.mrb[36].mxu0  ;;  %v3309_v32 = vmul.f32 %v2647_v22, %v2645_v20  ;;  %v1154_v34 = vadd.f32 %v1153_v29, %v3194_v5 }
 0x1b9   : > { %2664 = vpow2.f32 %v2089_v56  ;;  %v2090_v50 = vmul.f32 -1.442695, %v1343_v21  ;;  %v1155_v17 = vpop.f32.mrb[37].mxu1  ;;  %v1348_v37 = vpop.f32.mrb[37].mxu0 }
 0x1ba   : > { %v2651_v33 = vpop.eup %2650  ;;  %v1156_v53 = vadd.f32 %v1155_v17, %v3197_v6  ;;  %v1157_v41 = vpop.f32.mrb[38].mxu1  ;;  %v3316_v45 = vadd.f32 %v1346_v31, %v1154_v34 }
 0x1bb   : > { %v2653_v40 = vpop.eup %2652  ;;  %2666 = vpow2.f32 %v2090_v50  ;;  %v1350_v42 = vpop.f32.mrb[38].mxu0  ;;  %v3313_v43 = vmul.f32 %v2651_v33, %v2649_v24  ;;  %v1158_v18 = vadd.f32 %v1157_v41, %v3194_v5 }
 0x1bc   : > { %v1557_v25 = vadd.f32 1.0, %v2653_v40  ;;  %v1159_v47 = vpop.f32.mrb[39].mxu1  ;;  %v1352_v51 = vpop.f32.mrb[39].mxu0  ;;  %2668 = vtanh.f32 %v3283_v27  ;;  %v1349_v57 = vadd.f32 %v1348_v37, %v1156_v53 }
 0x1bd   : > { %v2655_v52 = vpop.eup %2654  ;;  %v1160_v55 = vadd.f32 %v1159_v47, %v3197_v6  ;;  %v2168_v58 = vpack.c.bf16 %v3313_v43, %v3309_v32  ;;  %v3322_v59 = vadd.f32 %v1350_v42, %v1158_v18  ;;  %v2924_v32 = vmov 1966171168  }
 0x1be   : > { %2670 = vrcp.f32 %v1557_v25  ;;  %v1558_v28 = vadd.f32 1.0, %v2655_v52  ;;  %v2657_v62 = vpop.eup %2656  ;;  %v2091_v3 = vmul.f32 -1.442695, %v1349_v57  ;;  %v1748_v43 = vunpack.c.l.s4 %v2924_v32 }
 0x1bf   : > { %2672 = vtanh.f32 %v3290_v39  ;;  %v1353_v9 = vadd.f32 %v1352_v51, %v1160_v55  ;;  %v1163_v11 = vpop.f32.mrb[40].mxu1 }
 0x1c0   : > { %v2659_v10 = vpop.eup %2658  ;;  %2674 = vrcp.f32 %v1558_v28  ;;  %v1356_v12 = vpop.f32.mrb[40].mxu0  ;;  %v1164_v20 = vadd.f32 %v1163_v11, %v3194_v5 }
 0x1c1   : > { %v2661_v46 = vpop.eup %2660  ;;  %2676 = vpow2.f32 %v2091_v3  ;;  %v2092_v27 = vmul.f32 -1.442695, %v1353_v9  ;;  %v3325_v13 = vmul.f32 %v2659_v10, %v2657_v62  ;;  %v1165_v56 = vpop.f32.mrb[41].mxu1 }
 0x1c2   : > { %v2663_v16 = vpop.eup %2662  ;;  %v1358_v21 = vpop.f32.mrb[41].mxu0  ;;  %v1166_v39 = vadd.f32 %v1165_v56, %v3197_v6  ;;  %v3332_v34 = vadd.f32 %v1356_v12, %v1164_v20 }
 0x1c3   : > { %v2665_v22 = vpop.eup %2664  ;;  %2678 = vpow2.f32 %v2092_v27  ;;  %v1167_v24 = vpop.f32.mrb[42].mxu1  ;;  %v3329_v29 = vmul.f32 %v2663_v16, %v2661_v46 }
 0x1c4   : > { %v1360_v50 = vpop.f32.mrb[42].mxu0  ;;  %v1559_v31 = vadd.f32 1.0, %v2665_v22  ;;  %v1168_v33 = vadd.f32 %v1167_v24, %v3194_v5  ;;  %v1169_v17 = vpop.f32.mrb[43].mxu1  ;;  %2680 = vtanh.f32 %v3299_v8  ;;  %v1359_v41 = vadd.f32 %v1358_v21, %v1166_v39 }
 0x1c5   : > { %v1362_v37 = vpop.f32.mrb[43].mxu0  ;;  %v2667_v40 = vpop.eup %2666  ;;  %v1170_v53 = vadd.f32 %v1169_v17, %v3197_v6  ;;  %v2172_v42 = vpack.c.bf16 %v3329_v29, %v3325_v13 }
 0x1c6   : > { %2682 = vrcp.f32 %v1559_v31  ;;  %v1560_v25 = vadd.f32 1.0, %v2667_v40  ;;  %v3338_v18 = vadd.f32 %v1360_v50, %v1168_v33  ;;  %v2669_v47 = vpop.eup %2668  ;;  %v2093_v51 = vmul.f32 -1.442695, %v1359_v41 }
 0x1c7   : > { %2684 = vtanh.f32 %v3306_v19  ;;  %v1363_v52 = vadd.f32 %v1362_v37, %v1170_v53  ;;  %v1173_v28 = vpop.f32.mrb[44].mxu1 }
 0x1c8   : > { %v2671_v55 = vpop.eup %2670  ;;  %2686 = vrcp.f32 %v1560_v25  ;;  %v1366_v62 = vpop.f32.mrb[44].mxu0  ;;  %v1174_v10 = vadd.f32 %v1173_v28, %v3194_v5 }
 0x1c9   : > { %v2673_v57 = vpop.eup %2672  ;;  %2688 = vpow2.f32 %v2093_v51  ;;  %v2094_v8 = vmul.f32 -1.442695, %v1363_v52  ;;  %v3341_v3 = vmul.f32 %v2671_v55, %v2669_v47  ;;  %v1175_v46 = vpop.f32.mrb[45].mxu1 }
 0x1ca   : > { %v2675_v9 = vpop.eup %2674  ;;  %v1368_v27 = vpop.f32.mrb[45].mxu0  ;;  %v1176_v19 = vadd.f32 %v1175_v46, %v3197_v6  ;;  %v3348_v22 = vadd.f32 %v1366_v62, %v1174_v10 }
 0x1cb   : > { %v2677_v11 = vpop.eup %2676  ;;  %2690 = vpow2.f32 %v2094_v8  ;;  %v1177_v12 = vpop.f32.mrb[46].mxu1  ;;  %v3345_v20 = vmul.f32 %v2675_v9, %v2673_v57 }
 0x1cc   : > { %v1370_v16 = vpop.f32.mrb[46].mxu0  ;;  %v1561_v56 = vadd.f32 1.0, %v2677_v11  ;;  %v1178_v21 = vadd.f32 %v1177_v12, %v3194_v5  ;;  %v1179_v39 = vpop.f32.mrb[47].mxu1  ;;  %2692 = vtanh.f32 %v3316_v45  ;;  %v1369_v33 = vadd.f32 %v1368_v27, %v1176_v19 }
 0x1cd   : > { %v1372_v24 = vpop.f32.mrb[47].mxu0  ;;  %v2679_v50 = vpop.eup %2678  ;;  %v1180_v31 = vadd.f32 %v1179_v39, %v3197_v6  ;;  %v2176_v17 = vpack.c.bf16 %v3345_v20, %v3341_v3 }
 0x1ce   : > { %2694 = vrcp.f32 %v1561_v56  ;;  %v1562_v37 = vadd.f32 1.0, %v2679_v50  ;;  %v3354_v40 = vadd.f32 %v1370_v16, %v1178_v21  ;;  %v2681_v53 = vpop.eup %2680  ;;  %v2095_v41 = vmul.f32 -1.442695, %v1369_v33 }
 0x1cf   : > { %2696 = vtanh.f32 %v3322_v59  ;;  %v1373_v25 = vadd.f32 %v1372_v24, %v1180_v31  ;;  %v1183_v52 = vpop.f32.mrb[48].mxu1 }
 0x1d0   : > { %v2683_v47 = vpop.eup %2682  ;;  %2698 = vrcp.f32 %v1562_v37  ;;  %v1376_v55 = vpop.f32.mrb[48].mxu0  ;;  %v1184_v28 = vadd.f32 %v1183_v52, %v3194_v5 }
 0x1d1   : > { %v2685_v51 = vpop.eup %2684  ;;  %2700 = vpow2.f32 %v2095_v41  ;;  %v2096_v45 = vmul.f32 -1.442695, %v1373_v25  ;;  %v1655_v57 = vmul.f32 %v2683_v47, %v2681_v53  ;;  %v1185_v62 = vpop.f32.mrb[49].mxu1 }
 0x1d2   : > { %v2687_v8 = vpop.eup %2686  ;;  %v1378_v9 = vpop.f32.mrb[49].mxu0  ;;  %v1186_v46 = vadd.f32 %v1185_v62, %v3197_v6  ;;  %v3360_v16 = vadd.f32 %v1376_v55, %v1184_v28 }
 0x1d3   : > { %v2689_v10 = vpop.eup %2688  ;;  %2702 = vpow2.f32 %v2096_v45  ;;  %v1187_v59 = vpop.f32.mrb[50].mxu1  ;;  %v1656_v11 = vmul.f32 %v2687_v8, %v2685_v51 }
 0x1d4   : > { %v1380_v27 = vpop.f32.mrb[50].mxu0  ;;  %v1563_v19 = vadd.f32 1.0, %v2689_v10  ;;  %v1188_v12 = vadd.f32 %v1187_v59, %v3194_v5  ;;  %v1189_v56 = vpop.f32.mrb[51].mxu1  ;;  %2704 = vtanh.f32 %v3332_v34  ;;  %v1379_v50 = vadd.f32 %v1378_v9, %v1186_v46 }
 0x1d5   : > { %v1382_v21 = vpop.f32.mrb[51].mxu0  ;;  %v2691_v39 = vpop.eup %2690  ;;  %v1190_v24 = vadd.f32 %v1189_v56, %v3197_v6  ;;  %v2146_v31 = vpack.c.bf16 %v1656_v11, %v1655_v57 }
 0x1d6   : > { %2706 = vrcp.f32 %v1563_v19  ;;  %v1564_v33 = vadd.f32 1.0, %v2691_v39  ;;  %v3364_v37 = vadd.f32 %v1380_v27, %v1188_v12  ;;  %v2693_v53 = vpop.eup %2692  ;;  %v2097_v41 = vmul.f32 -1.442695, %v1379_v50 }
 0x1d7   : > { %2708 = vtanh.f32 %v3338_v18  ;;  %v1383_v25 = vadd.f32 %v1382_v21, %v1190_v24  ;;  %2147 = vmatprep.subr.bf16.mxu1 %v2146_v31  ;;  %v1193_v45 = vpop.f32.mrb[52].mxu1 }
 0x1d8   : > { %v2695_v47 = vpop.eup %2694  ;;  %2710 = vrcp.f32 %v1564_v33  ;;  %2149 = vmatpush3.bf16.xpose.msra.mxu1 %v2148_v54  ;;  %v1386_v52 = vpop.f32.mrb[52].mxu0  ;;  %v1194_v8 = vadd.f32 %v1193_v45, %v3194_v5 }
 0x1d9   : > { %v2697_v34 = vpop.eup %2696  ;;  %2712 = vpow2.f32 %v2097_v41  ;;  %v2098_v51 = vmul.f32 -1.442695, %v1383_v25  ;;  %v1657_v55 = vmul.f32 %v2695_v47, %v2693_v53  ;;  %v1195_v28 = vpop.f32.mrb[53].mxu1 }
 0x1da   : > { %v2699_v57 = vpop.eup %2698  ;;  %v1388_v18 = vpop.f32.mrb[53].mxu0  ;;  %v1196_v9 = vadd.f32 %v1195_v28, %v3197_v6  ;;  %v3373_v54 = vadd.f32 %v1386_v52, %v1194_v8 }
 0x1db   : > { %v2701_v62 = vpop.eup %2700  ;;  %2714 = vpow2.f32 %v2098_v51  ;;  %v1197_v10 = vpop.f32.mrb[54].mxu1  ;;  %v1658_v59 = vmul.f32 %v2699_v57, %v2697_v34 }
 0x1dc   : > { %v1390_v46 = vpop.f32.mrb[54].mxu0  ;;  %v1565_v35 = vadd.f32 1.0, %v2701_v62  ;;  %v1198_v44 = vadd.f32 %v1197_v10, %v3194_v5  ;;  %v1199_v27 = vpop.f32.mrb[55].mxu1  ;;  %2716 = vtanh.f32 %v3348_v22  ;;  %v1389_v56 = vadd.f32 %v1388_v18, %v1196_v9 }
 0x1dd   : > { %v1392_v11 = vpop.f32.mrb[55].mxu0  ;;  %v2703_v19 = vpop.eup %2702  ;;  %v1200_v12 = vadd.f32 %v1199_v27, %v3197_v6  ;;  %v2150_v21 = vpack.c.bf16 %v1658_v59, %v1657_v55 }
 0x1de   : > { %2718 = vrcp.f32 %v1565_v35  ;;  %v1566_v39 = vadd.f32 1.0, %v2703_v19  ;;  %v3377_v24 = vadd.f32 %v1390_v46, %v1198_v44  ;;  %v2705_v50 = vpop.eup %2704  ;;  %v2099_v31 = vmul.f32 -1.442695, %v1389_v56 }
 0x1df   : > { %2720 = vtanh.f32 %v3354_v40  ;;  %v1393_v33 = vadd.f32 %v1392_v11, %v1200_v12  ;;  %2151 = vmatprep.subr.bf16.mxu1 %v2150_v21  ;;  %v1203_v25 = vpop.f32.mrb[56].mxu1 }
 0x1e0   : > { %v2707_v53 = vpop.eup %2706  ;;  %2722 = vrcp.f32 %v1566_v39  ;;  %2153 = vmatpush3.bf16.xpose.msra.mxu1 %v2152_v26  ;;  %v1396_v47 = vpop.f32.mrb[56].mxu0  ;;  %v1204_v45 = vadd.f32 %v1203_v25, %v3194_v5 }
 0x1e1   : > { %v2709_v22 = vpop.eup %2708  ;;  %2724 = vpow2.f32 %v2099_v31  ;;  %v2100_v41 = vmul.f32 -1.442695, %v1393_v33  ;;  %v1659_v34 = vmul.f32 %v2707_v53, %v2705_v50  ;;  %v1205_v52 = vpop.f32.mrb[57].mxu1 }
 0x1e2   : > { %v2711_v51 = vpop.eup %2710  ;;  %v1398_v40 = vpop.f32.mrb[57].mxu0  ;;  %v1206_v57 = vadd.f32 %v1205_v52, %v3197_v6  ;;  %v3386_v26 = vadd.f32 %v1396_v47, %v1204_v45 }
 0x1e3   : > { %v2713_v55 = vpop.eup %2712  ;;  %2726 = vpow2.f32 %v2100_v41  ;;  %v1207_v8 = vpop.f32.mrb[58].mxu1  ;;  %v1660_v18 = vmul.f32 %v2711_v51, %v2709_v22 }
 0x1e4   : > { %v1400_v28 = vpop.f32.mrb[58].mxu0  ;;  %v1567_v7 = vadd.f32 1.0, %v2713_v55  ;;  %v1208_v15 = vadd.f32 %v1207_v8, %v3194_v5  ;;  %v1209_v62 = vpop.f32.mrb[59].mxu1  ;;  %2728 = vtanh.f32 %v3360_v16  ;;  %v1399_v59 = vadd.f32 %v1398_v40, %v1206_v57 }
 0x1e5   : > { %v1402_v9 = vpop.f32.mrb[59].mxu0  ;;  %v2715_v10 = vpop.eup %2714  ;;  %v1210_v46 = vadd.f32 %v1209_v62, %v3197_v6  ;;  %v2154_v35 = vpack.c.bf16 %v1660_v18, %v1659_v34 }
 0x1e6   : > { %2730 = vrcp.f32 %v1567_v7  ;;  %v1568_v44 = vadd.f32 1.0, %v2715_v10  ;;  %v1401_v27 = vadd.f32 %v1400_v28, %v1208_v15  ;;  %v2717_v11 = vpop.eup %2716  ;;  %v2101_v19 = vmul.f32 -1.442695, %v1399_v59 }
 0x1e7   : > { %2732 = vtanh.f32 %v3364_v37  ;;  %v1403_v12 = vadd.f32 %v1402_v9, %v1210_v46  ;;  %2155 = vmatprep.subr.bf16.mxu1 %v2154_v35  ;;  %v1213_v39 = vpop.f32.mrb[60].mxu1 }
 0x1e8   : > { %v2719_v56 = vpop.eup %2718  ;;  %2734 = vrcp.f32 %v1568_v44  ;;  %2157 = vmatpush3.bf16.xpose.msra.mxu1 %v2156_v60  ;;  %v1406_v50 = vpop.f32.mrb[60].mxu0  ;;  %v1214_v53 = vadd.f32 %v1213_v39, %v3194_v5 }
 0x1e9   : > { %v2721_v16 = vpop.eup %2720  ;;  %2736 = vpow2.f32 %v2101_v19  ;;  %v2102_v21 = vmul.f32 -1.442695, %v1403_v12  ;;  %v1661_v31 = vmul.f32 %v2719_v56, %v2717_v11  ;;  %v1215_v22 = vpop.f32.mrb[61].mxu1 }
 0x1ea   : > { %v2723_v33 = vpop.eup %2722  ;;  %v1408_v37 = vpop.f32.mrb[61].mxu0  ;;  %v1216_v25 = vadd.f32 %v1215_v22, %v3197_v6  ;;  %v1407_v60 = vadd.f32 %v1406_v50, %v1214_v53 }
 0x1eb   : > { %v2725_v41 = vpop.eup %2724  ;;  %2738 = vpow2.f32 %v2102_v21  ;;  %v1217_v47 = vpop.f32.mrb[62].mxu1  ;;  %v1662_v51 = vmul.f32 %v2723_v33, %v2721_v16 }
 0x1ec   : > { %v1410_v34 = vpop.f32.mrb[62].mxu0  ;;  %v1569_v38 = vadd.f32 1.0, %v2725_v41  ;;  %v1218_v48 = vadd.f32 %v1217_v47, %v3194_v5  ;;  %v1219_v45 = vpop.f32.mrb[63].mxu1  ;;  %2740 = vtanh.f32 %v3373_v54  ;;  %v1409_v57 = vadd.f32 %v1408_v37, %v1216_v25 }
 0x1ed   : > { %v1412_v52 = vpop.f32.mrb[63].mxu0  ;;  %v2727_v40 = vpop.eup %2726  ;;  %v1220_v55 = vadd.f32 %v1219_v45, %v3197_v6  ;;  %v2158_v8 = vpack.c.bf16 %v1662_v51, %v1661_v31 }
 0x1ee   : > { %2742 = vrcp.f32 %v1569_v38  ;;  %v1570_v28 = vadd.f32 1.0, %v2727_v40  ;;  %v1411_v18 = vadd.f32 %v1410_v34, %v1218_v48  ;;  %v2729_v7 = vpop.eup %2728  ;;  %v2103_v15 = vmul.f32 -1.442695, %v1409_v57 }
 0x1ef   : > { %2744 = vtanh.f32 %v3377_v24  ;;  %v1413_v62 = vadd.f32 %v1412_v52, %v1220_v55  ;;  %2159 = vmatprep.subr.bf16.mxu1 %v2158_v8 }
 0x1f0   : > { %v2731_v5 = vpop.eup %2730  ;;  %2746 = vrcp.f32 %v1570_v28  ;;  %2161 = vmatpush3.bf16.xpose.msra.mxu1 %v2160_v36 }
 0x1f1   : > { %v2733_v54 = vpop.eup %2732  ;;  %2748 = vpow2.f32 %v2103_v15  ;;  %v2104_v6 = vmul.f32 -1.442695, %v1413_v62  ;;  %v1663_v9 = vmul.f32 %v2731_v5, %v2729_v7 }
 0x1f2   : > { %v2735_v10 = vpop.eup %2734 }
 0x1f3   : > { %v2737_v46 = vpop.eup %2736  ;;  %2750 = vpow2.f32 %v2104_v6  ;;  %v1664_v59 = vmul.f32 %v2735_v10, %v2733_v54 }
 0x1f4   : > { %v1571_v35 = vadd.f32 1.0, %v2737_v46  ;;  %2752 = vtanh.f32 %v3386_v26 }
 0x1f5   : > { %v2739_v44 = vpop.eup %2738  ;;  %v2162_v24 = vpack.c.bf16 %v1664_v59, %v1663_v9 }
 0x1f6   : > { %2754 = vrcp.f32 %v1571_v35  ;;  %v1572_v11 = vadd.f32 1.0, %v2739_v44  ;;  %v2741_v19 = vpop.eup %2740 }
 0x1f7   : > { %2756 = vtanh.f32 %v1401_v27  ;;  %2163 = vmatprep.subr.bf16.mxu1 %v2162_v24 }
 0x1f8   : > { %v2743_v61 = vpop.eup %2742  ;;  %2758 = vrcp.f32 %v1572_v11  ;;  %2165 = vmatpush3.bf16.xpose.msra.mxu1 %v2164_v14 }
 0x1f9   : > { %v2745_v23 = vpop.eup %2744  ;;  %v1665_v36 = vmul.f32 %v2743_v61, %v2741_v19  ;;  %2760 = vtanh.f32 %v1407_v60 }
 0x1fa   : > { %v2747_v12 = vpop.eup %2746 }
 0x1fb   : > { %v2749_v56 = vpop.eup %2748  ;;  %v1666_v16 = vmul.f32 %v2747_v12, %v2745_v23 }
 0x1fc   : > { %v1573_v21 = vadd.f32 1.0, %v2749_v56 }
 0x1fd   : > { %v2751_v39 = vpop.eup %2750  ;;  %v2166_v26 = vpack.c.bf16 %v1666_v16, %v1665_v36 }
 0x1fe   : > { %2762 = vrcp.f32 %v1573_v21  ;;  %v1574_v50 = vadd.f32 1.0, %v2751_v39  ;;  %v2753_v31 = vpop.eup %2752 }
 0x1ff   : > { %2764 = vtanh.f32 %v1411_v18  ;;  %2167 = vmatprep.subr.bf16.mxu1 %v2166_v26 }
 0x200   : > { %v2755_v27 = vpop.eup %2754  ;;  %2766 = vrcp.f32 %v1574_v50  ;;  %2169 = vmatpush3.bf16.xpose.msra.mxu1 %v2168_v58  ;;  %v1749_v58 = vunpack.c.0.s8 %v1748_v43 }
 0x201   : > { %v2757_v49 = vpop.eup %2756  ;;  %v1667_v63 = vmul.f32 %v2755_v27, %v2753_v31 }
 0x202   : > { %v2759_v14 = vpop.eup %2758  ;;  %v1752_v13 = vsub.s32 %v1749_v58, %v3182_v1 }
 0x203   : > { %v1668_v33 = vmul.f32 %v2759_v14, %v2757_v49  ;;  %v2761_v22 = vpop.eup %2760 }
 0x205   : > { %v2170_v53 = vpack.c.bf16 %v1668_v33, %v1667_v63 }
 0x207   : > { %2171 = vmatprep.subr.bf16.mxu1 %v2170_v53 }
 0x208   : > { %v2763_v37 = vpop.eup %2762  ;;  %2173 = vmatpush3.bf16.xpose.msra.mxu1 %v2172_v42 }
 0x209   : > { %v2765_v41 = vpop.eup %2764  ;;  %v1669_v25 = vmul.f32 %v2763_v37, %v2761_v22 }
 0x20a   : > { %v2767_v47 = vpop.eup %2766 }
 0x20b   : > { %v1670_v34 = vmul.f32 %v2767_v47, %v2765_v41 }
 0x20d   : > { %v2174_v51 = vpack.c.bf16 %v1670_v34, %v1669_v25 }
 0x20f   : > { %2175 = vmatprep.subr.bf16.mxu1 %v2174_v51 }
 0x210   : > { %2177 = vmatpush3.bf16.xpose.msra.mxu1 %v2176_v17 }
 0x217   : > { %2145 = vmatmul.mubr.f32.vlgmr.msra.gmra.mrb[64].mxu1 %v3226_v30 }
 0x2ea   : > { %v1738_v38 = vpop.f32.mrb[64].mxu1 }
 0x2eb   : > { %v1740_v29 = vpop.f32.mrb[65].mxu1 }
 0x2ec   : > { %v1746_v42 = vcombine.low %v1738_v38, %v1740_v29 }
 0x2ee   : > { %v1753_v48 = vrot.slane %v1746_v42, %v1752_v13 }
 0x2f0   : > { %v1760_v45 = vrot.slane %v1753_v48, %v1752_v13 }
 0x2f2   : > { %1769 = vst.msk [vmem:[%s3424_s22] sm:$0x3] %vm3420_vm0, %v1760_v45 }
 0x2f9   : > { %v1774_v30 = vld [vmem:[%s3424_s22] sm:$0x3] }
 0x2fa   : > { %v1779_v1 = vrot.slane %v1774_v30, %v3185_v2  ;;  %v1783_v3 = vrot.slane %v1774_v30, %v3191_v4 }
 0x2fc   : > { %v1787_v20 = vsel %vm1786_vm1, %v1779_v1, -inf  ;;  %v1788_v0 = vsel %vm1786_vm1, %v1783_v3, -inf }
 0x2fd   : > { %v1789_v17 = vmax.f32 %v1787_v20, %v1788_v0 }
 0x2ff   : > { %1790 = vmax.xlane.f32.xlu0 %v1789_v17 }
 0x38c   : > { %v1791_v52 = vpop.xlane.xlu0 %1790 }
 0x38d   : > { %v1796_v40 = vrot.slane %v1791_v52, %v3185_v2 }
 0x38f   : > { %v1798_v55 = vsub.f32 %v1774_v30, %v1796_v40 }
 0x391   : > { %v1799_v57 = vmul.f32 1.442695, %v1798_v55 }
 0x393   : > { %2768 = vpow2.f32 %v1799_v57 }
 0x39d   : > { %v2769_v8 = vpop.eup %2768 }
 0x39e   : > { %v1805_v28 = vrot.slane %v2769_v8, %v3185_v2  ;;  %v1809_v18 = vrot.slane %v2769_v8, %v3191_v4 }
 0x3a0   : > { %v1812_v7 = vsel %vm1786_vm1, %v1805_v28, 0.0  ;;  %v1813_v15 = vsel %vm1786_vm1, %v1809_v18, 0.0 }
 0x3a1   : > { %v1814_v62 = vadd.f32 %v1813_v15, %v1812_v7 }
 0x3a3   : > { %1815 = vadd.xlane.f32.xlu0 %v1814_v62 }
 0x430   : > { %v1816_v5 = vpop.xlane.xlu0 %1815 }
 0x431   : > { %v1821_v54 = vrot.slane %v1816_v5, %v3185_v2 }
 0x433   : > { %2770 = vrcp.f32 %v1821_v54 }
 0x43d   : > { %v2771_v6 = vpop.eup %2770 }
 0x43e   : > { %v1824_v9 = vmul.f32 %v2771_v6, %v2769_v8 }
 0x440   : > { %1825 = vst.msk [vmem:[%s3424_s22] sm:$0x3] %vm3420_vm0, %v1824_v9 }
 0x441   : > { %2843 = shalt.err (!%p2840_p5)
}
 0x442   : > { %s2844_s7 = scalar_lea.hbm %s3445_s6, 32  ;;  %s2848_s27 = scalar_lea.hbm %s3501_s4, 64 }
 0x443   : > { %p2845_p9 = scmp.ne.s32.totalorder %s3445_s6, %s2844_s7  ;;  %p2849_p3 = scmp.lt.u32.totalorder %s3445_s6, %s3501_s4 }
 0x444   : > { %p2850_p7 = scmp.lt.u32.totalorder %s2848_s27, %s2844_s7  ;;  %p2852_p4 = scmp.lt.u32.totalorder %s2844_s7, %s3445_s6 }
 0x445   : > { %p2846_p1 = pnand %p2845_p9, %p3047_p10 }
 0x446   : > { %p2851_p13 = por %p2850_p7, %p2849_p3 }
 0x447   : > { %p2847_p2 = pneg %p2846_p1 }
 0x448   : > { %p2853_p6 = por %p2852_p4, %p2851_p13 }
 0x44a   : > { %p2854_p8 = pnand %p2853_p6, %p2847_p2 }
 0x44c   : > { %2857 = shalt.err (!%p2854_p8)
}
 0x44d   : > { %2312 = dma.vmem_to_hbm [thread:$0]  (%p3047_p10), %s3447_s13, 32, %s3445_s6, %s1827_s9  }
 0x44e PF: > { %s1853_s22 = sand.u32 1, %s2896_s15   ;;  %p3521_p12 = scmp.ne.s32.totalorder %s3509_s26, 0 }
 0x44f   : > { %p3522_p11 = scmp.ge.s32.totalorder %s2916_s20, 2  ;;  %s1854_s28 = scalar_lea.sflag [#allocation4], %s1853_s22 }
 0x451   : > { %p2323_p0 = pnand %p3522_p11, %p3521_p12 }
 0x453   : > { %2891 = dma.done.wait (!%p2323_p0), %s1854_s28, 32  }
 0x454   : > { %2893 = vsyncadd (!%p2323_p0), %s1854_s28, 4294967264  ;;  %s21_s20 = sadd.s32 1, %s2916_s20   ;;  %s3523_s15 = smov %s2900_s16 }
 0x455   : > { %p18_p5 = scmp.ge.s32.totalorder %s21_s20, 4   ;;  %s3524_s16 = smov %s2904_s17 }
 0x456   : > { %s3525_s17 = smov %s3056_s10  ;;  %s3526_s18 = smov %s2912_s19 }
 0x457   : > { %s3527_s19 = smov %s3529_s5  ;;  %20 = sbr.rel (!%p18_p5) target bundleno = 7 (0x7), region = 90 }
 0x45e   :  { %1859 = vsyncpa [#allocation3], 1 }
 0x45f   :  { %1861 = vsyncpa [#allocation3 + $0x1], 1 }
 0x460   :  { %1862 = vsyncpa [#allocation6], 1 }
 0x461   :  { %1863 = vsyncpa [#allocation4], 1 }
 0x462   :  { %1865 = vsyncpa [#allocation4 + $0x1], 1 }

</bundles_post_ra>
